<compile_context>
chip_gen: v6e
topology: v6e:2x2x1
jax: 0.10.0
libtpu: 0.0.40
codegen_flags: <defaults>
</compile_context>

<pallas_src>
import functools
import math

import jax
import jax.numpy as jnp
from jax import lax
from jax.experimental import pallas as pl
from jax.experimental.pallas import tpu as pltpu

# ---------------- model dims (small, synthetic) ----------------
B = 2          # batch
T = 8          # target sequence length
S = 10         # source (encoder) sequence length
D = 32         # d_model
H = 4          # heads
DK = D // H    # per-head dim
F = 64         # feed-forward hidden
EPS = 1e-6
NEG_INF = -1e9
SCALE = 1.0 / math.sqrt(DK)


# ---------------- in-kernel building blocks ----------------
def _kernel_layer_norm(h, gamma, beta):
    # unbiased std (matches torch.Tensor.std()); eps added to std, not var
    mean = jnp.mean(h, axis=-1, keepdims=True)
    centered = h - mean
    var = jnp.sum(centered * centered, axis=-1, keepdims=True) * (1.0 / (D - 1))
    inv = pl.reciprocal(jnp.sqrt(var) + EPS, approx=True)      # EUP, ~free slot
    return gamma * centered * inv + beta


def _softmax_rows(s):
    s = s - jnp.max(s, axis=-1, keepdims=True)
    p = jnp.exp(s)
    return p * pl.reciprocal(jnp.sum(p, axis=-1, keepdims=True), approx=True)


def _make_decoder_kernel(bb):
    """bb = number of batch elements handled per grid step (static)."""

    def kernel(x_ref, enc_ref, tbias_ref, sbias_ref,
               self_wqkv_ref, self_wo_ref,
               cross_wq_ref, cross_wkv_ref, cross_wo_ref,
               w1_ref, b1_ref, w2_ref, b2_ref, ln_g_ref, ln_b_ref,
               out_ref, ctx_ref):
        # x_ref is already a flat token slab: (bb*T, D)
        x = x_ref[...]

        # ---------- residual 0: self-attention (pre-norm); dropout == identity ----------
        h = _kernel_layer_norm(x, ln_g_ref[0:1, :], ln_b_ref[0:1, :])
        # single fused QKV projection for the whole slab: (bb*T, D) x (D, 3D)
        qkv = jnp.dot(h, self_wqkv_ref[...], preferred_element_type=jnp.float32)
        for bi in range(bb):                                   # static unrolled (tiny)
            r0 = bi * T
            tb = tbias_ref[bi]                                 # (T, T) additive bias
            for hd in range(H):
                c0 = hd * DK
                q = qkv[r0:r0 + T, c0:c0 + DK]
                k = qkv[r0:r0 + T, D + c0:D + c0 + DK]
                v = qkv[r0:r0 + T, 2 * D + c0:2 * D + c0 + DK]
                # q @ k^T without an explicit transpose op
                s = lax.dot_general(q, k, (((1,), (1,)), ((), ())),
                                    preferred_element_type=jnp.float32) * SCALE + tb
                p = _softmax_rows(s)
                # head context at its static lane offset -> one fused Wo matmul below
                ctx_ref[r0:r0 + T, c0:c0 + DK] = jnp.dot(
                    p, v, preferred_element_type=jnp.float32)
        x = x + jnp.dot(ctx_ref[...], self_wo_ref[...],
                        preferred_element_type=jnp.float32)

        # ---------- residual 1: cross-attention ----------
        h = _kernel_layer_norm(x, ln_g_ref[1:2, :], ln_b_ref[1:2, :])
        qp = jnp.dot(h, cross_wq_ref[...], preferred_element_type=jnp.float32)  # (bb*T, D)
        for bi in range(bb):
            r0 = bi * T
            # fused K|V projection of this batch's encoder rows: (S, D) x (D, 2D)
            kv = jnp.dot(enc_ref[bi], cross_wkv_ref[...],
                         preferred_element_type=jnp.float32)
            sb = sbias_ref[bi]                                  # (T, S) additive bias
            for hd in range(H):
                c0 = hd * DK
                q = qp[r0:r0 + T, c0:c0 + DK]
                k = kv[:, c0:c0 + DK]
                v = kv[:, D + c0:D + c0 + DK]
                s = lax.dot_general(q, k, (((1,), (1,)), ((), ())),
                                    preferred_element_type=jnp.float32) * SCALE + sb
                p = _softmax_rows(s)
                ctx_ref[r0:r0 + T, c0:c0 + DK] = jnp.dot(
                    p, v, preferred_element_type=jnp.float32)
        x = x + jnp.dot(ctx_ref[...], cross_wo_ref[...],
                        preferred_element_type=jnp.float32)

        # ---------- residual 2: feed-forward (whole slab) ----------
        h = _kernel_layer_norm(x, ln_g_ref[2:3, :], ln_b_ref[2:3, :])
        hid = jnp.maximum(
            jnp.dot(h, w1_ref[...], preferred_element_type=jnp.float32) + b1_ref[...],
            0.0)
        x = x + jnp.dot(hid, w2_ref[...], preferred_element_type=jnp.float32) + b2_ref[...]

        out_ref[...] = x

    return kernel


# ---------------- host-side prep + pallas_call wrapper ----------------
def _num_tensorcores():
    # v7x has 2 TensorCores per chip; v5e/v6e have 1.
    try:
        kind = jax.devices()[0].device_kind.lower()
        if "v7" in kind:
            return 2
    except Exception:
        pass
    return 1


@functools.partial(jax.jit, static_argnames=("batch_block",))
def decoder_block(x, enc, tgt_mask, src_mask, params, *, batch_block):
    self_w, cross_w, w1, b1, w2, b2, ln_g, ln_b = params

    # Host-side layout plumbing (not compute hoisting): additive bias masks,
    # fused QKV / KV weight concatenation, and the (B,T,D)<->(B*T,D) slab reshape.
    tbias = jnp.where(tgt_mask == 0, NEG_INF, 0.0).astype(jnp.float32)
    sbias = jnp.where(src_mask == 0, NEG_INF, 0.0).astype(jnp.float32)
    self_wqkv = jnp.concatenate([self_w[0], self_w[1], self_w[2]], axis=1)   # (D, 3D)
    self_wo = self_w[3]                                                      # (D, D)
    cross_wq = cross_w[0]                                                    # (D, D)
    cross_wkv = jnp.concatenate([cross_w[1], cross_w[2]], axis=1)            # (D, 2D)
    cross_wo = cross_w[3]                                                    # (D, D)
    x_flat = x.reshape(B * T, D)

    bb = batch_block
    grid = (B // bb,)

    def full(arr):
        nd = arr.ndim
        return pl.BlockSpec(arr.shape, lambda g, _nd=nd: (0,) * _nd)

    in_specs = [
        pl.BlockSpec((bb * T, D), lambda g: (g, 0)),        # x token slab
        pl.BlockSpec((bb, S, D), lambda g: (g, 0, 0)),      # encoder output
        pl.BlockSpec((bb, T, T), lambda g: (g, 0, 0)),      # target additive bias
        pl.BlockSpec((bb, T, S), lambda g: (g, 0, 0)),      # source additive bias
        full(self_wqkv), full(self_wo),
        full(cross_wq), full(cross_wkv), full(cross_wo),
        full(w1), full(b1), full(w2), full(b2),
        full(ln_g), full(ln_b),
    ]

    # Single-TC chips (v5e/v6e): one grid step with the whole batch slab.
    # v7x: grid=(B,) marked "parallel" so the batch axis shards across the 2 TCs.
    # TODO(synk): if profiling on v7x shows this axis running serially on one core,
    # switch it to pltpu.CORE_PARALLEL for explicit cross-core sharding.
    sem = ("parallel",) if bb < B else ("arbitrary",)

    grid_spec = pltpu.PrefetchScalarGridSpec(
        num_scalar_prefetch=0,
        grid=grid,
        in_specs=in_specs,
        out_specs=pl.BlockSpec((bb * T, D), lambda g: (g, 0)),
        scratch_shapes=[pltpu.VMEM((bb * T, D), jnp.float32)],   # per-head context buffer
    )

    out_flat = pl.pallas_call(
        _make_decoder_kernel(bb),
        out_shape=jax.ShapeDtypeStruct((B * T, D), jnp.float32),
        grid_spec=grid_spec,
        compiler_params=pltpu.CompilerParams(dimension_semantics=sem),
    )(x_flat, enc, tbias, sbias,
      self_wqkv, self_wo, cross_wq, cross_wkv, cross_wo,
      w1, b1, w2, b2, ln_g, ln_b)
    return out_flat.reshape(B, T, D)


# ---------------- pure-JAX reference (original masked_fill / exact-div math) ----------------
def _ref_layer_norm(h, gamma, beta):
    mean = jnp.mean(h, axis=-1, keepdims=True)
    var = jnp.sum((h - mean) ** 2, axis=-1, keepdims=True) / (h.shape[-1] - 1)
    std = jnp.sqrt(var)
    return gamma * (h - mean) / (std + EPS) + beta


def _ref_mha(q_in, kv_in, mask, w4):
    wq, wk, wv, wo = w4
    q, k, v = q_in @ wq, kv_in @ wk, kv_in @ wv
    Tq, Tk = q.shape[0], k.shape[0]
    qh = q.reshape(Tq, H, DK).transpose(1, 0, 2)
    kh = k.reshape(Tk, H, DK).transpose(1, 0, 2)
    vh = v.reshape(Tk, H, DK).transpose(1, 0, 2)
    sc = jnp.einsum("htd,hsd->hts", qh, kh) / math.sqrt(DK)
    sc = jnp.where(mask[None] == 0, -1e9, sc)
    p = jax.nn.softmax(sc, axis=-1)
    o = jnp.einsum("hts,hsd->htd", p, vh).transpose(1, 0, 2).reshape(Tq, D)
    return o @ wo


def reference(x, enc, tmask, smask, params):
    self_w, cross_w, w1, b1, w2, b2, ln_g, ln_b = params
    outs = []
    for b in range(B):
        xb = x[b]
        h = _ref_layer_norm(xb, ln_g[0], ln_b[0])
        xb = xb + _ref_mha(h, h, tmask[b], self_w)
        h = _ref_layer_norm(xb, ln_g[1], ln_b[1])
        xb = xb + _ref_mha(h, enc[b], smask[b], cross_w)
        h = _ref_layer_norm(xb, ln_g[2], ln_b[2])
        xb = xb + (jnp.maximum(h @ w1 + b1[0], 0.0) @ w2 + b2[0])
        outs.append(xb)
    return jnp.stack(outs)


# ---------------- main ----------------
if __name__ == "__main__":
    key = jax.random.PRNGKey(0)
    ks = jax.random.split(key, 10)

    x = jax.random.normal(ks[0], (B, T, D), jnp.float32)
    enc = jax.random.normal(ks[1], (B, S, D), jnp.float32)

    # causal target mask, full source mask (last 2 source positions padded for batch 1)
    causal = jnp.tril(jnp.ones((T, T), jnp.float32))
    tgt_mask = jnp.broadcast_to(causal, (B, T, T))
    src_mask = jnp.ones((B, T, S), jnp.float32)
    src_mask = src_mask.at[1, :, S - 2:].set(0.0)

    scale = 0.02
    self_w = jax.random.normal(ks[2], (4, D, D), jnp.float32) * scale    # Wq,Wk,Wv,Wo
    cross_w = jax.random.normal(ks[3], (4, D, D), jnp.float32) * scale
    w1 = jax.random.normal(ks[4], (D, F), jnp.float32) * scale
    b1 = jax.random.normal(ks[5], (1, F), jnp.float32) * scale
    w2 = jax.random.normal(ks[6], (F, D), jnp.float32) * scale
    b2 = jax.random.normal(ks[7], (1, D), jnp.float32) * scale
    ln_g = jnp.ones((3, D), jnp.float32)
    ln_b = jnp.zeros((3, D), jnp.float32)

    params = (self_w, cross_w, w1, b1, w2, b2, ln_g, ln_b)

    # v7x: one batch element per TensorCore (grid=(B,), parallel).
    # v5e/v6e (single TC): collapse the batch grid to one step and process a
    # (B*T, D) token slab (grid=(1,)).
    bb = 1 if _num_tensorcores() >= 2 else B

    out = decoder_block(x, enc, tgt_mask, src_mask, params, batch_block=bb)
    out = jax.block_until_ready(out)

    ref = reference(x, enc, tgt_mask, src_mask, params)
    assert out.shape == (B, T, D)
    err = float(jnp.max(jnp.abs(out - ref)))
    assert jnp.allclose(out, ref, atol=1e-3, rtol=1e-3), err

    print("KERNEL_OK")
</pallas_src>

<mosaic_0001>
module attributes {stable_mosaic.version = 11 : i64} {
  func.func @kernel(%arg0: i32, %arg1: memref<16x32xf32, #tpu.memory_space<vmem>>, %arg2: memref<2x10x32xf32, #tpu.memory_space<vmem>>, %arg3: memref<2x8x8xf32, #tpu.memory_space<vmem>>, %arg4: memref<2x8x10xf32, #tpu.memory_space<vmem>>, %arg5: memref<32x96xf32, #tpu.memory_space<vmem>>, %arg6: memref<32x32xf32, #tpu.memory_space<vmem>>, %arg7: memref<32x32xf32, #tpu.memory_space<vmem>>, %arg8: memref<32x64xf32, #tpu.memory_space<vmem>>, %arg9: memref<32x32xf32, #tpu.memory_space<vmem>>, %arg10: memref<32x64xf32, #tpu.memory_space<vmem>>, %arg11: memref<1x64xf32, #tpu.memory_space<vmem>>, %arg12: memref<64x32xf32, #tpu.memory_space<vmem>>, %arg13: memref<1x32xf32, #tpu.memory_space<vmem>>, %arg14: memref<3x32xf32, #tpu.memory_space<vmem>>, %arg15: memref<3x32xf32, #tpu.memory_space<vmem>>, %arg16: memref<16x32xf32, #tpu.memory_space<vmem>>, %arg17: memref<16x32xf32, #tpu.memory_space<vmem>>) attributes {dimension_semantics = [#tpu.dimension_semantics<arbitrary>], iteration_bounds = array<i64: 1>, scalar_prefetch = 0 : i64, scratch_operands = 1 : i64, tpu.core_type = #tpu.core_type<tc>, window_params = [{transform_indices = @transform_0, window_bounds = array<i64: 16, 32>}, {transform_indices = @transform_1, window_bounds = array<i64: 2, 10, 32>}, {transform_indices = @transform_2, window_bounds = array<i64: 2, 8, 8>}, {transform_indices = @transform_3, window_bounds = array<i64: 2, 8, 10>}, {pipeline_mode = #tpu.pipeline_mode<synchronous>, transform_indices = @transform_4, window_bounds = array<i64: 32, 96>}, {pipeline_mode = #tpu.pipeline_mode<synchronous>, transform_indices = @transform_5, window_bounds = array<i64: 32, 32>}, {pipeline_mode = #tpu.pipeline_mode<synchronous>, transform_indices = @transform_6, window_bounds = array<i64: 32, 32>}, {pipeline_mode = #tpu.pipeline_mode<synchronous>, transform_indices = @transform_7, window_bounds = array<i64: 32, 64>}, {pipeline_mode = #tpu.pipeline_mode<synchronous>, transform_indices = @transform_8, window_bounds = array<i64: 32, 32>}, {pipeline_mode = #tpu.pipeline_mode<synchronous>, transform_indices = @transform_9, window_bounds = array<i64: 32, 64>}, {pipeline_mode = #tpu.pipeline_mode<synchronous>, transform_indices = @transform_10, window_bounds = array<i64: 1, 64>}, {pipeline_mode = #tpu.pipeline_mode<synchronous>, transform_indices = @transform_11, window_bounds = array<i64: 64, 32>}, {pipeline_mode = #tpu.pipeline_mode<synchronous>, transform_indices = @transform_12, window_bounds = array<i64: 1, 32>}, {pipeline_mode = #tpu.pipeline_mode<synchronous>, transform_indices = @transform_13, window_bounds = array<i64: 3, 32>}, {pipeline_mode = #tpu.pipeline_mode<synchronous>, transform_indices = @transform_14, window_bounds = array<i64: 3, 32>}, {transform_indices = @transform_15, window_bounds = array<i64: 16, 32>}]} {
    %c0 = arith.constant 0 : index
    %c0_0 = arith.constant 0 : index
    %0 = vector.load %arg1[%c0, %c0_0] : memref<16x32xf32, #tpu.memory_space<vmem>>, vector<16x32xf32>
    %c0_1 = arith.constant 0 : index
    %c0_2 = arith.constant 0 : index
    %1 = vector.load %arg14[%c0_1, %c0_2] : memref<3x32xf32, #tpu.memory_space<vmem>>, vector<1x32xf32>
    %c0_3 = arith.constant 0 : index
    %c0_4 = arith.constant 0 : index
    %2 = vector.load %arg15[%c0_3, %c0_4] : memref<3x32xf32, #tpu.memory_space<vmem>>, vector<1x32xf32>
    %cst = arith.constant dense<0.000000e+00> : vector<16xf32>
    %3 = vector.multi_reduction <add>, %0, %cst [1] : vector<16x32xf32> to vector<16xf32>
    %4 = vector.shape_cast %3 : vector<16xf32> to vector<16x1xf32>
    %cst_5 = arith.constant 3.200000e+01 : f32
    %5 = vector.broadcast %cst_5 : f32 to vector<16x1xf32>
    %6 = arith.divf %4, %5 : vector<16x1xf32>
    %7 = vector.broadcast %6 : vector<16x1xf32> to vector<16x32xf32>
    %8 = arith.subf %0, %7 : vector<16x32xf32>
    %9 = arith.mulf %8, %8 : vector<16x32xf32>
    %cst_6 = arith.constant dense<0.000000e+00> : vector<16xf32>
    %10 = vector.multi_reduction <add>, %9, %cst_6 [1] : vector<16x32xf32> to vector<16xf32>
    %11 = vector.shape_cast %10 : vector<16xf32> to vector<16x1xf32>
    %cst_7 = arith.constant 0.0322580636 : f32
    %12 = vector.broadcast %cst_7 : f32 to vector<16x1xf32>
    %13 = arith.mulf %11, %12 : vector<16x1xf32>
    %14 = math.sqrt %13 : vector<16x1xf32>
    %cst_8 = arith.constant 9.99999997E-7 : f32
    %15 = vector.broadcast %cst_8 : f32 to vector<16x1xf32>
    %16 = arith.addf %14, %15 : vector<16x1xf32>
    %17 = tpu.reciprocal %16 {approx = true} : vector<16x1xf32> -> vector<16x1xf32>
    %18 = vector.broadcast %1 : vector<1x32xf32> to vector<16x32xf32>
    %19 = arith.mulf %18, %8 : vector<16x32xf32>
    %20 = vector.broadcast %17 : vector<16x1xf32> to vector<16x32xf32>
    %21 = arith.mulf %19, %20 : vector<16x32xf32>
    %22 = vector.broadcast %2 : vector<1x32xf32> to vector<16x32xf32>
    %23 = arith.addf %21, %22 : vector<16x32xf32>
    %c0_9 = arith.constant 0 : index
    %c0_10 = arith.constant 0 : index
    %24 = vector.load %arg5[%c0_9, %c0_10] : memref<32x96xf32, #tpu.memory_space<vmem>>, vector<32x96xf32>
    %cst_11 = arith.constant dense<0.000000e+00> : vector<16x96xf32>
    %25 = tpu.matmul %23, %24, %cst_11 {dimension_numbers = #tpu.dot_dimension_numbers<[1], [0], [0], [1], [0, 0, 1, 1], [], []>} : vector<16x32xf32>, vector<32x96xf32>, vector<16x96xf32> -> vector<16x96xf32>
    %c0_12 = arith.constant 0 : index
    %c0_13 = arith.constant 0 : index
    %c0_14 = arith.constant 0 : index
    %26 = vector.load %arg3[%c0_12, %c0_13, %c0_14] : memref<2x8x8xf32, #tpu.memory_space<vmem>>, vector<1x8x8xf32>
    %27 = vector.shape_cast %26 : vector<1x8x8xf32> to vector<8x8xf32>
    %28 = vector.extract_strided_slice %25 {offsets = [0, 0], sizes = [8, 8], strides = [1, 1]} : vector<16x96xf32> to vector<8x8xf32>
    %29 = vector.extract_strided_slice %25 {offsets = [0, 32], sizes = [8, 8], strides = [1, 1]} : vector<16x96xf32> to vector<8x8xf32>
    %30 = vector.extract_strided_slice %25 {offsets = [0, 64], sizes = [8, 8], strides = [1, 1]} : vector<16x96xf32> to vector<8x8xf32>
    %cst_15 = arith.constant dense<0.000000e+00> : vector<8x8xf32>
    %31 = tpu.matmul %28, %29, %cst_15 {dimension_numbers = #tpu.dot_dimension_numbers<[1], [1], [0], [0], [0, 0, 1, 0], [], []>} : vector<8x8xf32>, vector<8x8xf32>, vector<8x8xf32> -> vector<8x8xf32>
    %cst_16 = arith.constant 0.353553385 : f32
    %32 = vector.broadcast %cst_16 : f32 to vector<8x8xf32>
    %33 = arith.mulf %31, %32 : vector<8x8xf32>
    %34 = arith.addf %33, %27 : vector<8x8xf32>
    %cst_17 = arith.constant dense<0xFF800000> : vector<8xf32>
    %35 = vector.multi_reduction <maximumf>, %34, %cst_17 [1] : vector<8x8xf32> to vector<8xf32>
    %36 = vector.shape_cast %35 : vector<8xf32> to vector<8x1xf32>
    %37 = vector.broadcast %36 : vector<8x1xf32> to vector<8x8xf32>
    %38 = arith.subf %34, %37 : vector<8x8xf32>
    %39 = math.exp %38 : vector<8x8xf32>
    %cst_18 = arith.constant dense<0.000000e+00> : vector<8xf32>
    %40 = vector.multi_reduction <add>, %39, %cst_18 [1] : vector<8x8xf32> to vector<8xf32>
    %41 = vector.shape_cast %40 : vector<8xf32> to vector<8x1xf32>
    %42 = tpu.reciprocal %41 {approx = true} : vector<8x1xf32> -> vector<8x1xf32>
    %43 = vector.broadcast %42 : vector<8x1xf32> to vector<8x8xf32>
    %44 = arith.mulf %39, %43 : vector<8x8xf32>
    %cst_19 = arith.constant dense<0.000000e+00> : vector<8x8xf32>
    %45 = tpu.matmul %44, %30, %cst_19 {dimension_numbers = #tpu.dot_dimension_numbers<[1], [0], [0], [1], [0, 0, 1, 1], [], []>} : vector<8x8xf32>, vector<8x8xf32>, vector<8x8xf32> -> vector<8x8xf32>
    %c0_20 = arith.constant 0 : index
    %c0_21 = arith.constant 0 : index
    %46 = vector.load %arg17[%c0_20, %c0_21] : memref<16x32xf32, #tpu.memory_space<vmem>>, vector<8x8xf32>
    tpu.vector_store %arg17[%c0_20, %c0_21], %45 {strides = array<i32>} : memref<16x32xf32, #tpu.memory_space<vmem>>, vector<8x8xf32>,
    %47 = vector.extract_strided_slice %25 {offsets = [0, 8], sizes = [8, 8], strides = [1, 1]} : vector<16x96xf32> to vector<8x8xf32>
    %48 = vector.extract_strided_slice %25 {offsets = [0, 40], sizes = [8, 8], strides = [1, 1]} : vector<16x96xf32> to vector<8x8xf32>
    %49 = vector.extract_strided_slice %25 {offsets = [0, 72], sizes = [8, 8], strides = [1, 1]} : vector<16x96xf32> to vector<8x8xf32>
    %cst_22 = arith.constant dense<0.000000e+00> : vector<8x8xf32>
    %50 = tpu.matmul %47, %48, %cst_22 {dimension_numbers = #tpu.dot_dimension_numbers<[1], [1], [0], [0], [0, 0, 1, 0], [], []>} : vector<8x8xf32>, vector<8x8xf32>, vector<8x8xf32> -> vector<8x8xf32>
    %cst_23 = arith.constant 0.353553385 : f32
    %51 = vector.broadcast %cst_23 : f32 to vector<8x8xf32>
    %52 = arith.mulf %50, %51 : vector<8x8xf32>
    %53 = arith.addf %52, %27 : vector<8x8xf32>
    %cst_24 = arith.constant dense<0xFF800000> : vector<8xf32>
    %54 = vector.multi_reduction <maximumf>, %53, %cst_24 [1] : vector<8x8xf32> to vector<8xf32>
    %55 = vector.shape_cast %54 : vector<8xf32> to vector<8x1xf32>
    %56 = vector.broadcast %55 : vector<8x1xf32> to vector<8x8xf32>
    %57 = arith.subf %53, %56 : vector<8x8xf32>
    %58 = math.exp %57 : vector<8x8xf32>
    %cst_25 = arith.constant dense<0.000000e+00> : vector<8xf32>
    %59 = vector.multi_reduction <add>, %58, %cst_25 [1] : vector<8x8xf32> to vector<8xf32>
    %60 = vector.shape_cast %59 : vector<8xf32> to vector<8x1xf32>
    %61 = tpu.reciprocal %60 {approx = true} : vector<8x1xf32> -> vector<8x1xf32>
    %62 = vector.broadcast %61 : vector<8x1xf32> to vector<8x8xf32>
    %63 = arith.mulf %58, %62 : vector<8x8xf32>
    %cst_26 = arith.constant dense<0.000000e+00> : vector<8x8xf32>
    %64 = tpu.matmul %63, %49, %cst_26 {dimension_numbers = #tpu.dot_dimension_numbers<[1], [0], [0], [1], [0, 0, 1, 1], [], []>} : vector<8x8xf32>, vector<8x8xf32>, vector<8x8xf32> -> vector<8x8xf32>
    %c0_27 = arith.constant 0 : index
    %c8 = arith.constant 8 : index
    %65 = vector.load %arg17[%c0_27, %c8] : memref<16x32xf32, #tpu.memory_space<vmem>>, vector<8x8xf32>
    tpu.vector_store %arg17[%c0_27, %c8], %64 {strides = array<i32>} : memref<16x32xf32, #tpu.memory_space<vmem>>, vector<8x8xf32>,
    %66 = vector.extract_strided_slice %25 {offsets = [0, 16], sizes = [8, 8], strides = [1, 1]} : vector<16x96xf32> to vector<8x8xf32>
    %67 = vector.extract_strided_slice %25 {offsets = [0, 48], sizes = [8, 8], strides = [1, 1]} : vector<16x96xf32> to vector<8x8xf32>
    %68 = vector.extract_strided_slice %25 {offsets = [0, 80], sizes = [8, 8], strides = [1, 1]} : vector<16x96xf32> to vector<8x8xf32>
    %cst_28 = arith.constant dense<0.000000e+00> : vector<8x8xf32>
    %69 = tpu.matmul %66, %67, %cst_28 {dimension_numbers = #tpu.dot_dimension_numbers<[1], [1], [0], [0], [0, 0, 1, 0], [], []>} : vector<8x8xf32>, vector<8x8xf32>, vector<8x8xf32> -> vector<8x8xf32>
    %cst_29 = arith.constant 0.353553385 : f32
    %70 = vector.broadcast %cst_29 : f32 to vector<8x8xf32>
    %71 = arith.mulf %69, %70 : vector<8x8xf32>
    %72 = arith.addf %71, %27 : vector<8x8xf32>
    %cst_30 = arith.constant dense<0xFF800000> : vector<8xf32>
    %73 = vector.multi_reduction <maximumf>, %72, %cst_30 [1] : vector<8x8xf32> to vector<8xf32>
    %74 = vector.shape_cast %73 : vector<8xf32> to vector<8x1xf32>
    %75 = vector.broadcast %74 : vector<8x1xf32> to vector<8x8xf32>
    %76 = arith.subf %72, %75 : vector<8x8xf32>
    %77 = math.exp %76 : vector<8x8xf32>
    %cst_31 = arith.constant dense<0.000000e+00> : vector<8xf32>
    %78 = vector.multi_reduction <add>, %77, %cst_31 [1] : vector<8x8xf32> to vector<8xf32>
    %79 = vector.shape_cast %78 : vector<8xf32> to vector<8x1xf32>
    %80 = tpu.reciprocal %79 {approx = true} : vector<8x1xf32> -> vector<8x1xf32>
    %81 = vector.broadcast %80 : vector<8x1xf32> to vector<8x8xf32>
    %82 = arith.mulf %77, %81 : vector<8x8xf32>
    %cst_32 = arith.constant dense<0.000000e+00> : vector<8x8xf32>
    %83 = tpu.matmul %82, %68, %cst_32 {dimension_numbers = #tpu.dot_dimension_numbers<[1], [0], [0], [1], [0, 0, 1, 1], [], []>} : vector<8x8xf32>, vector<8x8xf32>, vector<8x8xf32> -> vector<8x8xf32>
    %c0_33 = arith.constant 0 : index
    %c16 = arith.constant 16 : index
    %84 = vector.load %arg17[%c0_33, %c16] : memref<16x32xf32, #tpu.memory_space<vmem>>, vector<8x8xf32>
    tpu.vector_store %arg17[%c0_33, %c16], %83 {strides = array<i32>} : memref<16x32xf32, #tpu.memory_space<vmem>>, vector<8x8xf32>,
    %85 = vector.extract_strided_slice %25 {offsets = [0, 24], sizes = [8, 8], strides = [1, 1]} : vector<16x96xf32> to vector<8x8xf32>
    %86 = vector.extract_strided_slice %25 {offsets = [0, 56], sizes = [8, 8], strides = [1, 1]} : vector<16x96xf32> to vector<8x8xf32>
    %87 = vector.extract_strided_slice %25 {offsets = [0, 88], sizes = [8, 8], strides = [1, 1]} : vector<16x96xf32> to vector<8x8xf32>
    %cst_34 = arith.constant dense<0.000000e+00> : vector<8x8xf32>
    %88 = tpu.matmul %85, %86, %cst_34 {dimension_numbers = #tpu.dot_dimension_numbers<[1], [1], [0], [0], [0, 0, 1, 0], [], []>} : vector<8x8xf32>, vector<8x8xf32>, vector<8x8xf32> -> vector<8x8xf32>
    %cst_35 = arith.constant 0.353553385 : f32
    %89 = vector.broadcast %cst_35 : f32 to vector<8x8xf32>
    %90 = arith.mulf %88, %89 : vector<8x8xf32>
    %91 = arith.addf %90, %27 : vector<8x8xf32>
    %cst_36 = arith.constant dense<0xFF800000> : vector<8xf32>
    %92 = vector.multi_reduction <maximumf>, %91, %cst_36 [1] : vector<8x8xf32> to vector<8xf32>
    %93 = vector.shape_cast %92 : vector<8xf32> to vector<8x1xf32>
    %94 = vector.broadcast %93 : vector<8x1xf32> to vector<8x8xf32>
    %95 = arith.subf %91, %94 : vector<8x8xf32>
    %96 = math.exp %95 : vector<8x8xf32>
    %cst_37 = arith.constant dense<0.000000e+00> : vector<8xf32>
    %97 = vector.multi_reduction <add>, %96, %cst_37 [1] : vector<8x8xf32> to vector<8xf32>
    %98 = vector.shape_cast %97 : vector<8xf32> to vector<8x1xf32>
    %99 = tpu.reciprocal %98 {approx = true} : vector<8x1xf32> -> vector<8x1xf32>
    %100 = vector.broadcast %99 : vector<8x1xf32> to vector<8x8xf32>
    %101 = arith.mulf %96, %100 : vector<8x8xf32>
    %cst_38 = arith.constant dense<0.000000e+00> : vector<8x8xf32>
    %102 = tpu.matmul %101, %87, %cst_38 {dimension_numbers = #tpu.dot_dimension_numbers<[1], [0], [0], [1], [0, 0, 1, 1], [], []>} : vector<8x8xf32>, vector<8x8xf32>, vector<8x8xf32> -> vector<8x8xf32>
    %c0_39 = arith.constant 0 : index
    %c24 = arith.constant 24 : index
    %103 = vector.load %arg17[%c0_39, %c24] : memref<16x32xf32, #tpu.memory_space<vmem>>, vector<8x8xf32>
    tpu.vector_store %arg17[%c0_39, %c24], %102 {strides = array<i32>} : memref<16x32xf32, #tpu.memory_space<vmem>>, vector<8x8xf32>,
    %c1 = arith.constant 1 : index
    %c0_40 = arith.constant 0 : index
    %c0_41 = arith.constant 0 : index
    %104 = vector.load %arg3[%c1, %c0_40, %c0_41] : memref<2x8x8xf32, #tpu.memory_space<vmem>>, vector<1x8x8xf32>
    %105 = vector.shape_cast %104 : vector<1x8x8xf32> to vector<8x8xf32>
    %106 = vector.extract_strided_slice %25 {offsets = [8, 0], sizes = [8, 8], strides = [1, 1]} : vector<16x96xf32> to vector<8x8xf32>
    %107 = vector.extract_strided_slice %25 {offsets = [8, 32], sizes = [8, 8], strides = [1, 1]} : vector<16x96xf32> to vector<8x8xf32>
    %108 = vector.extract_strided_slice %25 {offsets = [8, 64], sizes = [8, 8], strides = [1, 1]} : vector<16x96xf32> to vector<8x8xf32>
    %cst_42 = arith.constant dense<0.000000e+00> : vector<8x8xf32>
    %109 = tpu.matmul %106, %107, %cst_42 {dimension_numbers = #tpu.dot_dimension_numbers<[1], [1], [0], [0], [0, 0, 1, 0], [], []>} : vector<8x8xf32>, vector<8x8xf32>, vector<8x8xf32> -> vector<8x8xf32>
    %cst_43 = arith.constant 0.353553385 : f32
    %110 = vector.broadcast %cst_43 : f32 to vector<8x8xf32>
    %111 = arith.mulf %109, %110 : vector<8x8xf32>
    %112 = arith.addf %111, %105 : vector<8x8xf32>
    %cst_44 = arith.constant dense<0xFF800000> : vector<8xf32>
    %113 = vector.multi_reduction <maximumf>, %112, %cst_44 [1] : vector<8x8xf32> to vector<8xf32>
    %114 = vector.shape_cast %113 : vector<8xf32> to vector<8x1xf32>
    %115 = vector.broadcast %114 : vector<8x1xf32> to vector<8x8xf32>
    %116 = arith.subf %112, %115 : vector<8x8xf32>
    %117 = math.exp %116 : vector<8x8xf32>
    %cst_45 = arith.constant dense<0.000000e+00> : vector<8xf32>
    %118 = vector.multi_reduction <add>, %117, %cst_45 [1] : vector<8x8xf32> to vector<8xf32>
    %119 = vector.shape_cast %118 : vector<8xf32> to vector<8x1xf32>
    %120 = tpu.reciprocal %119 {approx = true} : vector<8x1xf32> -> vector<8x1xf32>
    %121 = vector.broadcast %120 : vector<8x1xf32> to vector<8x8xf32>
    %122 = arith.mulf %117, %121 : vector<8x8xf32>
    %cst_46 = arith.constant dense<0.000000e+00> : vector<8x8xf32>
    %123 = tpu.matmul %122, %108, %cst_46 {dimension_numbers = #tpu.dot_dimension_numbers<[1], [0], [0], [1], [0, 0, 1, 1], [], []>} : vector<8x8xf32>, vector<8x8xf32>, vector<8x8xf32> -> vector<8x8xf32>
    %c8_47 = arith.constant 8 : index
    %c0_48 = arith.constant 0 : index
    %124 = vector.load %arg17[%c8_47, %c0_48] : memref<16x32xf32, #tpu.memory_space<vmem>>, vector<8x8xf32>
    tpu.vector_store %arg17[%c8_47, %c0_48], %123 {strides = array<i32>} : memref<16x32xf32, #tpu.memory_space<vmem>>, vector<8x8xf32>,
    %125 = vector.extract_strided_slice %25 {offsets = [8, 8], sizes = [8, 8], strides = [1, 1]} : vector<16x96xf32> to vector<8x8xf32>
    %126 = vector.extract_strided_slice %25 {offsets = [8, 40], sizes = [8, 8], strides = [1, 1]} : vector<16x96xf32> to vector<8x8xf32>
    %127 = vector.extract_strided_slice %25 {offsets = [8, 72], sizes = [8, 8], strides = [1, 1]} : vector<16x96xf32> to vector<8x8xf32>
    %cst_49 = arith.constant dense<0.000000e+00> : vector<8x8xf32>
    %128 = tpu.matmul %125, %126, %cst_49 {dimension_numbers = #tpu.dot_dimension_numbers<[1], [1], [0], [0], [0, 0, 1, 0], [], []>} : vector<8x8xf32>, vector<8x8xf32>, vector<8x8xf32> -> vector<8x8xf32>
    %cst_50 = arith.constant 0.353553385 : f32
    %129 = vector.broadcast %cst_50 : f32 to vector<8x8xf32>
    %130 = arith.mulf %128, %129 : vector<8x8xf32>
    %131 = arith.addf %130, %105 : vector<8x8xf32>
    %cst_51 = arith.constant dense<0xFF800000> : vector<8xf32>
    %132 = vector.multi_reduction <maximumf>, %131, %cst_51 [1] : vector<8x8xf32> to vector<8xf32>
    %133 = vector.shape_cast %132 : vector<8xf32> to vector<8x1xf32>
    %134 = vector.broadcast %133 : vector<8x1xf32> to vector<8x8xf32>
    %135 = arith.subf %131, %134 : vector<8x8xf32>
    %136 = math.exp %135 : vector<8x8xf32>
    %cst_52 = arith.constant dense<0.000000e+00> : vector<8xf32>
    %137 = vector.multi_reduction <add>, %136, %cst_52 [1] : vector<8x8xf32> to vector<8xf32>
    %138 = vector.shape_cast %137 : vector<8xf32> to vector<8x1xf32>
    %139 = tpu.reciprocal %138 {approx = true} : vector<8x1xf32> -> vector<8x1xf32>
    %140 = vector.broadcast %139 : vector<8x1xf32> to vector<8x8xf32>
    %141 = arith.mulf %136, %140 : vector<8x8xf32>
    %cst_53 = arith.constant dense<0.000000e+00> : vector<8x8xf32>
    %142 = tpu.matmul %141, %127, %cst_53 {dimension_numbers = #tpu.dot_dimension_numbers<[1], [0], [0], [1], [0, 0, 1, 1], [], []>} : vector<8x8xf32>, vector<8x8xf32>, vector<8x8xf32> -> vector<8x8xf32>
    %c8_54 = arith.constant 8 : index
    %c8_55 = arith.constant 8 : index
    %143 = vector.load %arg17[%c8_54, %c8_55] : memref<16x32xf32, #tpu.memory_space<vmem>>, vector<8x8xf32>
    tpu.vector_store %arg17[%c8_54, %c8_55], %142 {strides = array<i32>} : memref<16x32xf32, #tpu.memory_space<vmem>>, vector<8x8xf32>,
    %144 = vector.extract_strided_slice %25 {offsets = [8, 16], sizes = [8, 8], strides = [1, 1]} : vector<16x96xf32> to vector<8x8xf32>
    %145 = vector.extract_strided_slice %25 {offsets = [8, 48], sizes = [8, 8], strides = [1, 1]} : vector<16x96xf32> to vector<8x8xf32>
    %146 = vector.extract_strided_slice %25 {offsets = [8, 80], sizes = [8, 8], strides = [1, 1]} : vector<16x96xf32> to vector<8x8xf32>
    %cst_56 = arith.constant dense<0.000000e+00> : vector<8x8xf32>
    %147 = tpu.matmul %144, %145, %cst_56 {dimension_numbers = #tpu.dot_dimension_numbers<[1], [1], [0], [0], [0, 0, 1, 0], [], []>} : vector<8x8xf32>, vector<8x8xf32>, vector<8x8xf32> -> vector<8x8xf32>
    %cst_57 = arith.constant 0.353553385 : f32
    %148 = vector.broadcast %cst_57 : f32 to vector<8x8xf32>
    %149 = arith.mulf %147, %148 : vector<8x8xf32>
    %150 = arith.addf %149, %105 : vector<8x8xf32>
    %cst_58 = arith.constant dense<0xFF800000> : vector<8xf32>
    %151 = vector.multi_reduction <maximumf>, %150, %cst_58 [1] : vector<8x8xf32> to vector<8xf32>
    %152 = vector.shape_cast %151 : vector<8xf32> to vector<8x1xf32>
    %153 = vector.broadcast %152 : vector<8x1xf32> to vector<8x8xf32>
    %154 = arith.subf %150, %153 : vector<8x8xf32>
    %155 = math.exp %154 : vector<8x8xf32>
    %cst_59 = arith.constant dense<0.000000e+00> : vector<8xf32>
    %156 = vector.multi_reduction <add>, %155, %cst_59 [1] : vector<8x8xf32> to vector<8xf32>
    %157 = vector.shape_cast %156 : vector<8xf32> to vector<8x1xf32>
    %158 = tpu.reciprocal %157 {approx = true} : vector<8x1xf32> -> vector<8x1xf32>
    %159 = vector.broadcast %158 : vector<8x1xf32> to vector<8x8xf32>
    %160 = arith.mulf %155, %159 : vector<8x8xf32>
    %cst_60 = arith.constant dense<0.000000e+00> : vector<8x8xf32>
    %161 = tpu.matmul %160, %146, %cst_60 {dimension_numbers = #tpu.dot_dimension_numbers<[1], [0], [0], [1], [0, 0, 1, 1], [], []>} : vector<8x8xf32>, vector<8x8xf32>, vector<8x8xf32> -> vector<8x8xf32>
    %c8_61 = arith.constant 8 : index
    %c16_62 = arith.constant 16 : index
    %162 = vector.load %arg17[%c8_61, %c16_62] : memref<16x32xf32, #tpu.memory_space<vmem>>, vector<8x8xf32>
    tpu.vector_store %arg17[%c8_61, %c16_62], %161 {strides = array<i32>} : memref<16x32xf32, #tpu.memory_space<vmem>>, vector<8x8xf32>,
    %163 = vector.extract_strided_slice %25 {offsets = [8, 24], sizes = [8, 8], strides = [1, 1]} : vector<16x96xf32> to vector<8x8xf32>
    %164 = vector.extract_strided_slice %25 {offsets = [8, 56], sizes = [8, 8], strides = [1, 1]} : vector<16x96xf32> to vector<8x8xf32>
    %165 = vector.extract_strided_slice %25 {offsets = [8, 88], sizes = [8, 8], strides = [1, 1]} : vector<16x96xf32> to vector<8x8xf32>
    %cst_63 = arith.constant dense<0.000000e+00> : vector<8x8xf32>
    %166 = tpu.matmul %163, %164, %cst_63 {dimension_numbers = #tpu.dot_dimension_numbers<[1], [1], [0], [0], [0, 0, 1, 0], [], []>} : vector<8x8xf32>, vector<8x8xf32>, vector<8x8xf32> -> vector<8x8xf32>
    %cst_64 = arith.constant 0.353553385 : f32
    %167 = vector.broadcast %cst_64 : f32 to vector<8x8xf32>
    %168 = arith.mulf %166, %167 : vector<8x8xf32>
    %169 = arith.addf %168, %105 : vector<8x8xf32>
    %cst_65 = arith.constant dense<0xFF800000> : vector<8xf32>
    %170 = vector.multi_reduction <maximumf>, %169, %cst_65 [1] : vector<8x8xf32> to vector<8xf32>
    %171 = vector.shape_cast %170 : vector<8xf32> to vector<8x1xf32>
    %172 = vector.broadcast %171 : vector<8x1xf32> to vector<8x8xf32>
    %173 = arith.subf %169, %172 : vector<8x8xf32>
    %174 = math.exp %173 : vector<8x8xf32>
    %cst_66 = arith.constant dense<0.000000e+00> : vector<8xf32>
    %175 = vector.multi_reduction <add>, %174, %cst_66 [1] : vector<8x8xf32> to vector<8xf32>
    %176 = vector.shape_cast %175 : vector<8xf32> to vector<8x1xf32>
    %177 = tpu.reciprocal %176 {approx = true} : vector<8x1xf32> -> vector<8x1xf32>
    %178 = vector.broadcast %177 : vector<8x1xf32> to vector<8x8xf32>
    %179 = arith.mulf %174, %178 : vector<8x8xf32>
    %cst_67 = arith.constant dense<0.000000e+00> : vector<8x8xf32>
    %180 = tpu.matmul %179, %165, %cst_67 {dimension_numbers = #tpu.dot_dimension_numbers<[1], [0], [0], [1], [0, 0, 1, 1], [], []>} : vector<8x8xf32>, vector<8x8xf32>, vector<8x8xf32> -> vector<8x8xf32>
    %c8_68 = arith.constant 8 : index
    %c24_69 = arith.constant 24 : index
    %181 = vector.load %arg17[%c8_68, %c24_69] : memref<16x32xf32, #tpu.memory_space<vmem>>, vector<8x8xf32>
    tpu.vector_store %arg17[%c8_68, %c24_69], %180 {strides = array<i32>} : memref<16x32xf32, #tpu.memory_space<vmem>>, vector<8x8xf32>,
    %c0_70 = arith.constant 0 : index
    %c0_71 = arith.constant 0 : index
    %182 = vector.load %arg17[%c0_70, %c0_71] : memref<16x32xf32, #tpu.memory_space<vmem>>, vector<16x32xf32>
    %c0_72 = arith.constant 0 : index
    %c0_73 = arith.constant 0 : index
    %183 = vector.load %arg6[%c0_72, %c0_73] : memref<32x32xf32, #tpu.memory_space<vmem>>, vector<32x32xf32>
    %cst_74 = arith.constant dense<0.000000e+00> : vector<16x32xf32>
    %184 = tpu.matmul %182, %183, %cst_74 {dimension_numbers = #tpu.dot_dimension_numbers<[1], [0], [0], [1], [0, 0, 1, 1], [], []>} : vector<16x32xf32>, vector<32x32xf32>, vector<16x32xf32> -> vector<16x32xf32>
    %185 = arith.addf %0, %184 : vector<16x32xf32>
    %c1_75 = arith.constant 1 : index
    %c0_76 = arith.constant 0 : index
    %186 = vector.load %arg14[%c1_75, %c0_76] : memref<3x32xf32, #tpu.memory_space<vmem>>, vector<1x32xf32>
    %c1_77 = arith.constant 1 : index
    %c0_78 = arith.constant 0 : index
    %187 = vector.load %arg15[%c1_77, %c0_78] : memref<3x32xf32, #tpu.memory_space<vmem>>, vector<1x32xf32>
    %cst_79 = arith.constant dense<0.000000e+00> : vector<16xf32>
    %188 = vector.multi_reduction <add>, %185, %cst_79 [1] : vector<16x32xf32> to vector<16xf32>
    %189 = vector.shape_cast %188 : vector<16xf32> to vector<16x1xf32>
    %cst_80 = arith.constant 3.200000e+01 : f32
    %190 = vector.broadcast %cst_80 : f32 to vector<16x1xf32>
    %191 = arith.divf %189, %190 : vector<16x1xf32>
    %192 = vector.broadcast %191 : vector<16x1xf32> to vector<16x32xf32>
    %193 = arith.subf %185, %192 : vector<16x32xf32>
    %194 = arith.mulf %193, %193 : vector<16x32xf32>
    %cst_81 = arith.constant dense<0.000000e+00> : vector<16xf32>
    %195 = vector.multi_reduction <add>, %194, %cst_81 [1] : vector<16x32xf32> to vector<16xf32>
    %196 = vector.shape_cast %195 : vector<16xf32> to vector<16x1xf32>
    %cst_82 = arith.constant 0.0322580636 : f32
    %197 = vector.broadcast %cst_82 : f32 to vector<16x1xf32>
    %198 = arith.mulf %196, %197 : vector<16x1xf32>
    %199 = math.sqrt %198 : vector<16x1xf32>
    %cst_83 = arith.constant 9.99999997E-7 : f32
    %200 = vector.broadcast %cst_83 : f32 to vector<16x1xf32>
    %201 = arith.addf %199, %200 : vector<16x1xf32>
    %202 = tpu.reciprocal %201 {approx = true} : vector<16x1xf32> -> vector<16x1xf32>
    %203 = vector.broadcast %186 : vector<1x32xf32> to vector<16x32xf32>
    %204 = arith.mulf %203, %193 : vector<16x32xf32>
    %205 = vector.broadcast %202 : vector<16x1xf32> to vector<16x32xf32>
    %206 = arith.mulf %204, %205 : vector<16x32xf32>
    %207 = vector.broadcast %187 : vector<1x32xf32> to vector<16x32xf32>
    %208 = arith.addf %206, %207 : vector<16x32xf32>
    %c0_84 = arith.constant 0 : index
    %c0_85 = arith.constant 0 : index
    %209 = vector.load %arg7[%c0_84, %c0_85] : memref<32x32xf32, #tpu.memory_space<vmem>>, vector<32x32xf32>
    %cst_86 = arith.constant dense<0.000000e+00> : vector<16x32xf32>
    %210 = tpu.matmul %208, %209, %cst_86 {dimension_numbers = #tpu.dot_dimension_numbers<[1], [0], [0], [1], [0, 0, 1, 1], [], []>} : vector<16x32xf32>, vector<32x32xf32>, vector<16x32xf32> -> vector<16x32xf32>
    %c0_87 = arith.constant 0 : index
    %c0_88 = arith.constant 0 : index
    %c0_89 = arith.constant 0 : index
    %211 = vector.load %arg2[%c0_87, %c0_88, %c0_89] : memref<2x10x32xf32, #tpu.memory_space<vmem>>, vector<1x10x32xf32>
    %212 = vector.shape_cast %211 : vector<1x10x32xf32> to vector<10x32xf32>
    %c0_90 = arith.constant 0 : index
    %c0_91 = arith.constant 0 : index
    %213 = vector.load %arg8[%c0_90, %c0_91] : memref<32x64xf32, #tpu.memory_space<vmem>>, vector<32x64xf32>
    %cst_92 = arith.constant dense<0.000000e+00> : vector<10x64xf32>
    %214 = tpu.matmul %212, %213, %cst_92 {dimension_numbers = #tpu.dot_dimension_numbers<[1], [0], [0], [1], [0, 0, 1, 1], [], []>} : vector<10x32xf32>, vector<32x64xf32>, vector<10x64xf32> -> vector<10x64xf32>
    %c0_93 = arith.constant 0 : index
    %c0_94 = arith.constant 0 : index
    %c0_95 = arith.constant 0 : index
    %215 = vector.load %arg4[%c0_93, %c0_94, %c0_95] : memref<2x8x10xf32, #tpu.memory_space<vmem>>, vector<1x8x10xf32>
    %216 = vector.shape_cast %215 : vector<1x8x10xf32> to vector<8x10xf32>
    %217 = vector.extract_strided_slice %210 {offsets = [0, 0], sizes = [8, 8], strides = [1, 1]} : vector<16x32xf32> to vector<8x8xf32>
    %218 = vector.extract_strided_slice %214 {offsets = [0, 0], sizes = [10, 8], strides = [1, 1]} : vector<10x64xf32> to vector<10x8xf32>
    %219 = vector.extract_strided_slice %214 {offsets = [0, 32], sizes = [10, 8], strides = [1, 1]} : vector<10x64xf32> to vector<10x8xf32>
    %cst_96 = arith.constant dense<0.000000e+00> : vector<8x10xf32>
    %220 = tpu.matmul %217, %218, %cst_96 {dimension_numbers = #tpu.dot_dimension_numbers<[1], [1], [0], [0], [0, 0, 1, 0], [], []>} : vector<8x8xf32>, vector<10x8xf32>, vector<8x10xf32> -> vector<8x10xf32>
    %cst_97 = arith.constant 0.353553385 : f32
    %221 = vector.broadcast %cst_97 : f32 to vector<8x10xf32>
    %222 = arith.mulf %220, %221 : vector<8x10xf32>
    %223 = arith.addf %222, %216 : vector<8x10xf32>
    %cst_98 = arith.constant dense<0xFF800000> : vector<8xf32>
    %224 = vector.multi_reduction <maximumf>, %223, %cst_98 [1] : vector<8x10xf32> to vector<8xf32>
    %225 = vector.shape_cast %224 : vector<8xf32> to vector<8x1xf32>
    %226 = vector.broadcast %225 : vector<8x1xf32> to vector<8x10xf32>
    %227 = arith.subf %223, %226 : vector<8x10xf32>
    %228 = math.exp %227 : vector<8x10xf32>
    %cst_99 = arith.constant dense<0.000000e+00> : vector<8xf32>
    %229 = vector.multi_reduction <add>, %228, %cst_99 [1] : vector<8x10xf32> to vector<8xf32>
    %230 = vector.shape_cast %229 : vector<8xf32> to vector<8x1xf32>
    %231 = tpu.reciprocal %230 {approx = true} : vector<8x1xf32> -> vector<8x1xf32>
    %232 = vector.broadcast %231 : vector<8x1xf32> to vector<8x10xf32>
    %233 = arith.mulf %228, %232 : vector<8x10xf32>
    %cst_100 = arith.constant dense<0.000000e+00> : vector<8x8xf32>
    %234 = tpu.matmul %233, %219, %cst_100 {dimension_numbers = #tpu.dot_dimension_numbers<[1], [0], [0], [1], [0, 0, 1, 1], [], []>} : vector<8x10xf32>, vector<10x8xf32>, vector<8x8xf32> -> vector<8x8xf32>
    %c0_101 = arith.constant 0 : index
    %c0_102 = arith.constant 0 : index
    %235 = vector.load %arg17[%c0_101, %c0_102] : memref<16x32xf32, #tpu.memory_space<vmem>>, vector<8x8xf32>
    tpu.vector_store %arg17[%c0_101, %c0_102], %234 {strides = array<i32>} : memref<16x32xf32, #tpu.memory_space<vmem>>, vector<8x8xf32>,
    %236 = vector.extract_strided_slice %210 {offsets = [0, 8], sizes = [8, 8], strides = [1, 1]} : vector<16x32xf32> to vector<8x8xf32>
    %237 = vector.extract_strided_slice %214 {offsets = [0, 8], sizes = [10, 8], strides = [1, 1]} : vector<10x64xf32> to vector<10x8xf32>
    %238 = vector.extract_strided_slice %214 {offsets = [0, 40], sizes = [10, 8], strides = [1, 1]} : vector<10x64xf32> to vector<10x8xf32>
    %cst_103 = arith.constant dense<0.000000e+00> : vector<8x10xf32>
    %239 = tpu.matmul %236, %237, %cst_103 {dimension_numbers = #tpu.dot_dimension_numbers<[1], [1], [0], [0], [0, 0, 1, 0], [], []>} : vector<8x8xf32>, vector<10x8xf32>, vector<8x10xf32> -> vector<8x10xf32>
    %cst_104 = arith.constant 0.353553385 : f32
    %240 = vector.broadcast %cst_104 : f32 to vector<8x10xf32>
    %241 = arith.mulf %239, %240 : vector<8x10xf32>
    %242 = arith.addf %241, %216 : vector<8x10xf32>
    %cst_105 = arith.constant dense<0xFF800000> : vector<8xf32>
    %243 = vector.multi_reduction <maximumf>, %242, %cst_105 [1] : vector<8x10xf32> to vector<8xf32>
    %244 = vector.shape_cast %243 : vector<8xf32> to vector<8x1xf32>
    %245 = vector.broadcast %244 : vector<8x1xf32> to vector<8x10xf32>
    %246 = arith.subf %242, %245 : vector<8x10xf32>
    %247 = math.exp %246 : vector<8x10xf32>
    %cst_106 = arith.constant dense<0.000000e+00> : vector<8xf32>
    %248 = vector.multi_reduction <add>, %247, %cst_106 [1] : vector<8x10xf32> to vector<8xf32>
    %249 = vector.shape_cast %248 : vector<8xf32> to vector<8x1xf32>
    %250 = tpu.reciprocal %249 {approx = true} : vector<8x1xf32> -> vector<8x1xf32>
    %251 = vector.broadcast %250 : vector<8x1xf32> to vector<8x10xf32>
    %252 = arith.mulf %247, %251 : vector<8x10xf32>
    %cst_107 = arith.constant dense<0.000000e+00> : vector<8x8xf32>
    %253 = tpu.matmul %252, %238, %cst_107 {dimension_numbers = #tpu.dot_dimension_numbers<[1], [0], [0], [1], [0, 0, 1, 1], [], []>} : vector<8x10xf32>, vector<10x8xf32>, vector<8x8xf32> -> vector<8x8xf32>
    %c0_108 = arith.constant 0 : index
    %c8_109 = arith.constant 8 : index
    %254 = vector.load %arg17[%c0_108, %c8_109] : memref<16x32xf32, #tpu.memory_space<vmem>>, vector<8x8xf32>
    tpu.vector_store %arg17[%c0_108, %c8_109], %253 {strides = array<i32>} : memref<16x32xf32, #tpu.memory_space<vmem>>, vector<8x8xf32>,
    %255 = vector.extract_strided_slice %210 {offsets = [0, 16], sizes = [8, 8], strides = [1, 1]} : vector<16x32xf32> to vector<8x8xf32>
    %256 = vector.extract_strided_slice %214 {offsets = [0, 16], sizes = [10, 8], strides = [1, 1]} : vector<10x64xf32> to vector<10x8xf32>
    %257 = vector.extract_strided_slice %214 {offsets = [0, 48], sizes = [10, 8], strides = [1, 1]} : vector<10x64xf32> to vector<10x8xf32>
    %cst_110 = arith.constant dense<0.000000e+00> : vector<8x10xf32>
    %258 = tpu.matmul %255, %256, %cst_110 {dimension_numbers = #tpu.dot_dimension_numbers<[1], [1], [0], [0], [0, 0, 1, 0], [], []>} : vector<8x8xf32>, vector<10x8xf32>, vector<8x10xf32> -> vector<8x10xf32>
    %cst_111 = arith.constant 0.353553385 : f32
    %259 = vector.broadcast %cst_111 : f32 to vector<8x10xf32>
    %260 = arith.mulf %258, %259 : vector<8x10xf32>
    %261 = arith.addf %260, %216 : vector<8x10xf32>
    %cst_112 = arith.constant dense<0xFF800000> : vector<8xf32>
    %262 = vector.multi_reduction <maximumf>, %261, %cst_112 [1] : vector<8x10xf32> to vector<8xf32>
    %263 = vector.shape_cast %262 : vector<8xf32> to vector<8x1xf32>
    %264 = vector.broadcast %263 : vector<8x1xf32> to vector<8x10xf32>
    %265 = arith.subf %261, %264 : vector<8x10xf32>
    %266 = math.exp %265 : vector<8x10xf32>
    %cst_113 = arith.constant dense<0.000000e+00> : vector<8xf32>
    %267 = vector.multi_reduction <add>, %266, %cst_113 [1] : vector<8x10xf32> to vector<8xf32>
    %268 = vector.shape_cast %267 : vector<8xf32> to vector<8x1xf32>
    %269 = tpu.reciprocal %268 {approx = true} : vector<8x1xf32> -> vector<8x1xf32>
    %270 = vector.broadcast %269 : vector<8x1xf32> to vector<8x10xf32>
    %271 = arith.mulf %266, %270 : vector<8x10xf32>
    %cst_114 = arith.constant dense<0.000000e+00> : vector<8x8xf32>
    %272 = tpu.matmul %271, %257, %cst_114 {dimension_numbers = #tpu.dot_dimension_numbers<[1], [0], [0], [1], [0, 0, 1, 1], [], []>} : vector<8x10xf32>, vector<10x8xf32>, vector<8x8xf32> -> vector<8x8xf32>
    %c0_115 = arith.constant 0 : index
    %c16_116 = arith.constant 16 : index
    %273 = vector.load %arg17[%c0_115, %c16_116] : memref<16x32xf32, #tpu.memory_space<vmem>>, vector<8x8xf32>
    tpu.vector_store %arg17[%c0_115, %c16_116], %272 {strides = array<i32>} : memref<16x32xf32, #tpu.memory_space<vmem>>, vector<8x8xf32>,
    %274 = vector.extract_strided_slice %210 {offsets = [0, 24], sizes = [8, 8], strides = [1, 1]} : vector<16x32xf32> to vector<8x8xf32>
    %275 = vector.extract_strided_slice %214 {offsets = [0, 24], sizes = [10, 8], strides = [1, 1]} : vector<10x64xf32> to vector<10x8xf32>
    %276 = vector.extract_strided_slice %214 {offsets = [0, 56], sizes = [10, 8], strides = [1, 1]} : vector<10x64xf32> to vector<10x8xf32>
    %cst_117 = arith.constant dense<0.000000e+00> : vector<8x10xf32>
    %277 = tpu.matmul %274, %275, %cst_117 {dimension_numbers = #tpu.dot_dimension_numbers<[1], [1], [0], [0], [0, 0, 1, 0], [], []>} : vector<8x8xf32>, vector<10x8xf32>, vector<8x10xf32> -> vector<8x10xf32>
    %cst_118 = arith.constant 0.353553385 : f32
    %278 = vector.broadcast %cst_118 : f32 to vector<8x10xf32>
    %279 = arith.mulf %277, %278 : vector<8x10xf32>
    %280 = arith.addf %279, %216 : vector<8x10xf32>
    %cst_119 = arith.constant dense<0xFF800000> : vector<8xf32>
    %281 = vector.multi_reduction <maximumf>, %280, %cst_119 [1] : vector<8x10xf32> to vector<8xf32>
    %282 = vector.shape_cast %281 : vector<8xf32> to vector<8x1xf32>
    %283 = vector.broadcast %282 : vector<8x1xf32> to vector<8x10xf32>
    %284 = arith.subf %280, %283 : vector<8x10xf32>
    %285 = math.exp %284 : vector<8x10xf32>
    %cst_120 = arith.constant dense<0.000000e+00> : vector<8xf32>
    %286 = vector.multi_reduction <add>, %285, %cst_120 [1] : vector<8x10xf32> to vector<8xf32>
    %287 = vector.shape_cast %286 : vector<8xf32> to vector<8x1xf32>
    %288 = tpu.reciprocal %287 {approx = true} : vector<8x1xf32> -> vector<8x1xf32>
    %289 = vector.broadcast %288 : vector<8x1xf32> to vector<8x10xf32>
    %290 = arith.mulf %285, %289 : vector<8x10xf32>
    %cst_121 = arith.constant dense<0.000000e+00> : vector<8x8xf32>
    %291 = tpu.matmul %290, %276, %cst_121 {dimension_numbers = #tpu.dot_dimension_numbers<[1], [0], [0], [1], [0, 0, 1, 1], [], []>} : vector<8x10xf32>, vector<10x8xf32>, vector<8x8xf32> -> vector<8x8xf32>
    %c0_122 = arith.constant 0 : index
    %c24_123 = arith.constant 24 : index
    %292 = vector.load %arg17[%c0_122, %c24_123] : memref<16x32xf32, #tpu.memory_space<vmem>>, vector<8x8xf32>
    tpu.vector_store %arg17[%c0_122, %c24_123], %291 {strides = array<i32>} : memref<16x32xf32, #tpu.memory_space<vmem>>, vector<8x8xf32>,
    %c1_124 = arith.constant 1 : index
    %c0_125 = arith.constant 0 : index
    %c0_126 = arith.constant 0 : index
    %293 = vector.load %arg2[%c1_124, %c0_125, %c0_126] : memref<2x10x32xf32, #tpu.memory_space<vmem>>, vector<1x10x32xf32>
    %294 = vector.shape_cast %293 : vector<1x10x32xf32> to vector<10x32xf32>
    %c0_127 = arith.constant 0 : index
    %c0_128 = arith.constant 0 : index
    %295 = vector.load %arg8[%c0_127, %c0_128] : memref<32x64xf32, #tpu.memory_space<vmem>>, vector<32x64xf32>
    %cst_129 = arith.constant dense<0.000000e+00> : vector<10x64xf32>
    %296 = tpu.matmul %294, %295, %cst_129 {dimension_numbers = #tpu.dot_dimension_numbers<[1], [0], [0], [1], [0, 0, 1, 1], [], []>} : vector<10x32xf32>, vector<32x64xf32>, vector<10x64xf32> -> vector<10x64xf32>
    %c1_130 = arith.constant 1 : index
    %c0_131 = arith.constant 0 : index
    %c0_132 = arith.constant 0 : index
    %297 = vector.load %arg4[%c1_130, %c0_131, %c0_132] : memref<2x8x10xf32, #tpu.memory_space<vmem>>, vector<1x8x10xf32>
    %298 = vector.shape_cast %297 : vector<1x8x10xf32> to vector<8x10xf32>
    %299 = vector.extract_strided_slice %210 {offsets = [8, 0], sizes = [8, 8], strides = [1, 1]} : vector<16x32xf32> to vector<8x8xf32>
    %300 = vector.extract_strided_slice %296 {offsets = [0, 0], sizes = [10, 8], strides = [1, 1]} : vector<10x64xf32> to vector<10x8xf32>
    %301 = vector.extract_strided_slice %296 {offsets = [0, 32], sizes = [10, 8], strides = [1, 1]} : vector<10x64xf32> to vector<10x8xf32>
    %cst_133 = arith.constant dense<0.000000e+00> : vector<8x10xf32>
    %302 = tpu.matmul %299, %300, %cst_133 {dimension_numbers = #tpu.dot_dimension_numbers<[1], [1], [0], [0], [0, 0, 1, 0], [], []>} : vector<8x8xf32>, vector<10x8xf32>, vector<8x10xf32> -> vector<8x10xf32>
    %cst_134 = arith.constant 0.353553385 : f32
    %303 = vector.broadcast %cst_134 : f32 to vector<8x10xf32>
    %304 = arith.mulf %302, %303 : vector<8x10xf32>
    %305 = arith.addf %304, %298 : vector<8x10xf32>
    %cst_135 = arith.constant dense<0xFF800000> : vector<8xf32>
    %306 = vector.multi_reduction <maximumf>, %305, %cst_135 [1] : vector<8x10xf32> to vector<8xf32>
    %307 = vector.shape_cast %306 : vector<8xf32> to vector<8x1xf32>
    %308 = vector.broadcast %307 : vector<8x1xf32> to vector<8x10xf32>
    %309 = arith.subf %305, %308 : vector<8x10xf32>
    %310 = math.exp %309 : vector<8x10xf32>
    %cst_136 = arith.constant dense<0.000000e+00> : vector<8xf32>
    %311 = vector.multi_reduction <add>, %310, %cst_136 [1] : vector<8x10xf32> to vector<8xf32>
    %312 = vector.shape_cast %311 : vector<8xf32> to vector<8x1xf32>
    %313 = tpu.reciprocal %312 {approx = true} : vector<8x1xf32> -> vector<8x1xf32>
    %314 = vector.broadcast %313 : vector<8x1xf32> to vector<8x10xf32>
    %315 = arith.mulf %310, %314 : vector<8x10xf32>
    %cst_137 = arith.constant dense<0.000000e+00> : vector<8x8xf32>
    %316 = tpu.matmul %315, %301, %cst_137 {dimension_numbers = #tpu.dot_dimension_numbers<[1], [0], [0], [1], [0, 0, 1, 1], [], []>} : vector<8x10xf32>, vector<10x8xf32>, vector<8x8xf32> -> vector<8x8xf32>
    %c8_138 = arith.constant 8 : index
    %c0_139 = arith.constant 0 : index
    %317 = vector.load %arg17[%c8_138, %c0_139] : memref<16x32xf32, #tpu.memory_space<vmem>>, vector<8x8xf32>
    tpu.vector_store %arg17[%c8_138, %c0_139], %316 {strides = array<i32>} : memref<16x32xf32, #tpu.memory_space<vmem>>, vector<8x8xf32>,
    %318 = vector.extract_strided_slice %210 {offsets = [8, 8], sizes = [8, 8], strides = [1, 1]} : vector<16x32xf32> to vector<8x8xf32>
    %319 = vector.extract_strided_slice %296 {offsets = [0, 8], sizes = [10, 8], strides = [1, 1]} : vector<10x64xf32> to vector<10x8xf32>
    %320 = vector.extract_strided_slice %296 {offsets = [0, 40], sizes = [10, 8], strides = [1, 1]} : vector<10x64xf32> to vector<10x8xf32>
    %cst_140 = arith.constant dense<0.000000e+00> : vector<8x10xf32>
    %321 = tpu.matmul %318, %319, %cst_140 {dimension_numbers = #tpu.dot_dimension_numbers<[1], [1], [0], [0], [0, 0, 1, 0], [], []>} : vector<8x8xf32>, vector<10x8xf32>, vector<8x10xf32> -> vector<8x10xf32>
    %cst_141 = arith.constant 0.353553385 : f32
    %322 = vector.broadcast %cst_141 : f32 to vector<8x10xf32>
    %323 = arith.mulf %321, %322 : vector<8x10xf32>
    %324 = arith.addf %323, %298 : vector<8x10xf32>
    %cst_142 = arith.constant dense<0xFF800000> : vector<8xf32>
    %325 = vector.multi_reduction <maximumf>, %324, %cst_142 [1] : vector<8x10xf32> to vector<8xf32>
    %326 = vector.shape_cast %325 : vector<8xf32> to vector<8x1xf32>
    %327 = vector.broadcast %326 : vector<8x1xf32> to vector<8x10xf32>
    %328 = arith.subf %324, %327 : vector<8x10xf32>
    %329 = math.exp %328 : vector<8x10xf32>
    %cst_143 = arith.constant dense<0.000000e+00> : vector<8xf32>
    %330 = vector.multi_reduction <add>, %329, %cst_143 [1] : vector<8x10xf32> to vector<8xf32>
    %331 = vector.shape_cast %330 : vector<8xf32> to vector<8x1xf32>
    %332 = tpu.reciprocal %331 {approx = true} : vector<8x1xf32> -> vector<8x1xf32>
    %333 = vector.broadcast %332 : vector<8x1xf32> to vector<8x10xf32>
    %334 = arith.mulf %329, %333 : vector<8x10xf32>
    %cst_144 = arith.constant dense<0.000000e+00> : vector<8x8xf32>
    %335 = tpu.matmul %334, %320, %cst_144 {dimension_numbers = #tpu.dot_dimension_numbers<[1], [0], [0], [1], [0, 0, 1, 1], [], []>} : vector<8x10xf32>, vector<10x8xf32>, vector<8x8xf32> -> vector<8x8xf32>
    %c8_145 = arith.constant 8 : index
    %c8_146 = arith.constant 8 : index
    %336 = vector.load %arg17[%c8_145, %c8_146] : memref<16x32xf32, #tpu.memory_space<vmem>>, vector<8x8xf32>
    tpu.vector_store %arg17[%c8_145, %c8_146], %335 {strides = array<i32>} : memref<16x32xf32, #tpu.memory_space<vmem>>, vector<8x8xf32>,
    %337 = vector.extract_strided_slice %210 {offsets = [8, 16], sizes = [8, 8], strides = [1, 1]} : vector<16x32xf32> to vector<8x8xf32>
    %338 = vector.extract_strided_slice %296 {offsets = [0, 16], sizes = [10, 8], strides = [1, 1]} : vector<10x64xf32> to vector<10x8xf32>
    %339 = vector.extract_strided_slice %296 {offsets = [0, 48], sizes = [10, 8], strides = [1, 1]} : vector<10x64xf32> to vector<10x8xf32>
    %cst_147 = arith.constant dense<0.000000e+00> : vector<8x10xf32>
    %340 = tpu.matmul %337, %338, %cst_147 {dimension_numbers = #tpu.dot_dimension_numbers<[1], [1], [0], [0], [0, 0, 1, 0], [], []>} : vector<8x8xf32>, vector<10x8xf32>, vector<8x10xf32> -> vector<8x10xf32>
    %cst_148 = arith.constant 0.353553385 : f32
    %341 = vector.broadcast %cst_148 : f32 to vector<8x10xf32>
    %342 = arith.mulf %340, %341 : vector<8x10xf32>
    %343 = arith.addf %342, %298 : vector<8x10xf32>
    %cst_149 = arith.constant dense<0xFF800000> : vector<8xf32>
    %344 = vector.multi_reduction <maximumf>, %343, %cst_149 [1] : vector<8x10xf32> to vector<8xf32>
    %345 = vector.shape_cast %344 : vector<8xf32> to vector<8x1xf32>
    %346 = vector.broadcast %345 : vector<8x1xf32> to vector<8x10xf32>
    %347 = arith.subf %343, %346 : vector<8x10xf32>
    %348 = math.exp %347 : vector<8x10xf32>
    %cst_150 = arith.constant dense<0.000000e+00> : vector<8xf32>
    %349 = vector.multi_reduction <add>, %348, %cst_150 [1] : vector<8x10xf32> to vector<8xf32>
    %350 = vector.shape_cast %349 : vector<8xf32> to vector<8x1xf32>
    %351 = tpu.reciprocal %350 {approx = true} : vector<8x1xf32> -> vector<8x1xf32>
    %352 = vector.broadcast %351 : vector<8x1xf32> to vector<8x10xf32>
    %353 = arith.mulf %348, %352 : vector<8x10xf32>
    %cst_151 = arith.constant dense<0.000000e+00> : vector<8x8xf32>
    %354 = tpu.matmul %353, %339, %cst_151 {dimension_numbers = #tpu.dot_dimension_numbers<[1], [0], [0], [1], [0, 0, 1, 1], [], []>} : vector<8x10xf32>, vector<10x8xf32>, vector<8x8xf32> -> vector<8x8xf32>
    %c8_152 = arith.constant 8 : index
    %c16_153 = arith.constant 16 : index
    %355 = vector.load %arg17[%c8_152, %c16_153] : memref<16x32xf32, #tpu.memory_space<vmem>>, vector<8x8xf32>
    tpu.vector_store %arg17[%c8_152, %c16_153], %354 {strides = array<i32>} : memref<16x32xf32, #tpu.memory_space<vmem>>, vector<8x8xf32>,
    %356 = vector.extract_strided_slice %210 {offsets = [8, 24], sizes = [8, 8], strides = [1, 1]} : vector<16x32xf32> to vector<8x8xf32>
    %357 = vector.extract_strided_slice %296 {offsets = [0, 24], sizes = [10, 8], strides = [1, 1]} : vector<10x64xf32> to vector<10x8xf32>
    %358 = vector.extract_strided_slice %296 {offsets = [0, 56], sizes = [10, 8], strides = [1, 1]} : vector<10x64xf32> to vector<10x8xf32>
    %cst_154 = arith.constant dense<0.000000e+00> : vector<8x10xf32>
    %359 = tpu.matmul %356, %357, %cst_154 {dimension_numbers = #tpu.dot_dimension_numbers<[1], [1], [0], [0], [0, 0, 1, 0], [], []>} : vector<8x8xf32>, vector<10x8xf32>, vector<8x10xf32> -> vector<8x10xf32>
    %cst_155 = arith.constant 0.353553385 : f32
    %360 = vector.broadcast %cst_155 : f32 to vector<8x10xf32>
    %361 = arith.mulf %359, %360 : vector<8x10xf32>
    %362 = arith.addf %361, %298 : vector<8x10xf32>
    %cst_156 = arith.constant dense<0xFF800000> : vector<8xf32>
    %363 = vector.multi_reduction <maximumf>, %362, %cst_156 [1] : vector<8x10xf32> to vector<8xf32>
    %364 = vector.shape_cast %363 : vector<8xf32> to vector<8x1xf32>
    %365 = vector.broadcast %364 : vector<8x1xf32> to vector<8x10xf32>
    %366 = arith.subf %362, %365 : vector<8x10xf32>
    %367 = math.exp %366 : vector<8x10xf32>
    %cst_157 = arith.constant dense<0.000000e+00> : vector<8xf32>
    %368 = vector.multi_reduction <add>, %367, %cst_157 [1] : vector<8x10xf32> to vector<8xf32>
    %369 = vector.shape_cast %368 : vector<8xf32> to vector<8x1xf32>
    %370 = tpu.reciprocal %369 {approx = true} : vector<8x1xf32> -> vector<8x1xf32>
    %371 = vector.broadcast %370 : vector<8x1xf32> to vector<8x10xf32>
    %372 = arith.mulf %367, %371 : vector<8x10xf32>
    %cst_158 = arith.constant dense<0.000000e+00> : vector<8x8xf32>
    %373 = tpu.matmul %372, %358, %cst_158 {dimension_numbers = #tpu.dot_dimension_numbers<[1], [0], [0], [1], [0, 0, 1, 1], [], []>} : vector<8x10xf32>, vector<10x8xf32>, vector<8x8xf32> -> vector<8x8xf32>
    %c8_159 = arith.constant 8 : index
    %c24_160 = arith.constant 24 : index
    %374 = vector.load %arg17[%c8_159, %c24_160] : memref<16x32xf32, #tpu.memory_space<vmem>>, vector<8x8xf32>
    tpu.vector_store %arg17[%c8_159, %c24_160], %373 {strides = array<i32>} : memref<16x32xf32, #tpu.memory_space<vmem>>, vector<8x8xf32>,
    %c0_161 = arith.constant 0 : index
    %c0_162 = arith.constant 0 : index
    %375 = vector.load %arg17[%c0_161, %c0_162] : memref<16x32xf32, #tpu.memory_space<vmem>>, vector<16x32xf32>
    %c0_163 = arith.constant 0 : index
    %c0_164 = arith.constant 0 : index
    %376 = vector.load %arg9[%c0_163, %c0_164] : memref<32x32xf32, #tpu.memory_space<vmem>>, vector<32x32xf32>
    %cst_165 = arith.constant dense<0.000000e+00> : vector<16x32xf32>
    %377 = tpu.matmul %375, %376, %cst_165 {dimension_numbers = #tpu.dot_dimension_numbers<[1], [0], [0], [1], [0, 0, 1, 1], [], []>} : vector<16x32xf32>, vector<32x32xf32>, vector<16x32xf32> -> vector<16x32xf32>
    %378 = arith.addf %185, %377 : vector<16x32xf32>
    %c2 = arith.constant 2 : index
    %c0_166 = arith.constant 0 : index
    %379 = vector.load %arg14[%c2, %c0_166] : memref<3x32xf32, #tpu.memory_space<vmem>>, vector<1x32xf32>
    %c2_167 = arith.constant 2 : index
    %c0_168 = arith.constant 0 : index
    %380 = vector.load %arg15[%c2_167, %c0_168] : memref<3x32xf32, #tpu.memory_space<vmem>>, vector<1x32xf32>
    %cst_169 = arith.constant dense<0.000000e+00> : vector<16xf32>
    %381 = vector.multi_reduction <add>, %378, %cst_169 [1] : vector<16x32xf32> to vector<16xf32>
    %382 = vector.shape_cast %381 : vector<16xf32> to vector<16x1xf32>
    %cst_170 = arith.constant 3.200000e+01 : f32
    %383 = vector.broadcast %cst_170 : f32 to vector<16x1xf32>
    %384 = arith.divf %382, %383 : vector<16x1xf32>
    %385 = vector.broadcast %384 : vector<16x1xf32> to vector<16x32xf32>
    %386 = arith.subf %378, %385 : vector<16x32xf32>
    %387 = arith.mulf %386, %386 : vector<16x32xf32>
    %cst_171 = arith.constant dense<0.000000e+00> : vector<16xf32>
    %388 = vector.multi_reduction <add>, %387, %cst_171 [1] : vector<16x32xf32> to vector<16xf32>
    %389 = vector.shape_cast %388 : vector<16xf32> to vector<16x1xf32>
    %cst_172 = arith.constant 0.0322580636 : f32
    %390 = vector.broadcast %cst_172 : f32 to vector<16x1xf32>
    %391 = arith.mulf %389, %390 : vector<16x1xf32>
    %392 = math.sqrt %391 : vector<16x1xf32>
    %cst_173 = arith.constant 9.99999997E-7 : f32
    %393 = vector.broadcast %cst_173 : f32 to vector<16x1xf32>
    %394 = arith.addf %392, %393 : vector<16x1xf32>
    %395 = tpu.reciprocal %394 {approx = true} : vector<16x1xf32> -> vector<16x1xf32>
    %396 = vector.broadcast %379 : vector<1x32xf32> to vector<16x32xf32>
    %397 = arith.mulf %396, %386 : vector<16x32xf32>
    %398 = vector.broadcast %395 : vector<16x1xf32> to vector<16x32xf32>
    %399 = arith.mulf %397, %398 : vector<16x32xf32>
    %400 = vector.broadcast %380 : vector<1x32xf32> to vector<16x32xf32>
    %401 = arith.addf %399, %400 : vector<16x32xf32>
    %c0_174 = arith.constant 0 : index
    %c0_175 = arith.constant 0 : index
    %402 = vector.load %arg10[%c0_174, %c0_175] : memref<32x64xf32, #tpu.memory_space<vmem>>, vector<32x64xf32>
    %cst_176 = arith.constant dense<0.000000e+00> : vector<16x64xf32>
    %403 = tpu.matmul %401, %402, %cst_176 {dimension_numbers = #tpu.dot_dimension_numbers<[1], [0], [0], [1], [0, 0, 1, 1], [], []>} : vector<16x32xf32>, vector<32x64xf32>, vector<16x64xf32> -> vector<16x64xf32>
    %c0_177 = arith.constant 0 : index
    %c0_178 = arith.constant 0 : index
    %404 = vector.load %arg11[%c0_177, %c0_178] : memref<1x64xf32, #tpu.memory_space<vmem>>, vector<1x64xf32>
    %405 = vector.broadcast %404 : vector<1x64xf32> to vector<16x64xf32>
    %406 = arith.addf %403, %405 : vector<16x64xf32>
    %cst_179 = arith.constant 0.000000e+00 : f32
    %407 = vector.broadcast %cst_179 : f32 to vector<16x64xf32>
    %408 = arith.maximumf %406, %407 : vector<16x64xf32>
    %c0_180 = arith.constant 0 : index
    %c0_181 = arith.constant 0 : index
    %409 = vector.load %arg12[%c0_180, %c0_181] : memref<64x32xf32, #tpu.memory_space<vmem>>, vector<64x32xf32>
    %cst_182 = arith.constant dense<0.000000e+00> : vector<16x32xf32>
    %410 = tpu.matmul %408, %409, %cst_182 {dimension_numbers = #tpu.dot_dimension_numbers<[1], [0], [0], [1], [0, 0, 1, 1], [], []>} : vector<16x64xf32>, vector<64x32xf32>, vector<16x32xf32> -> vector<16x32xf32>
    %411 = arith.addf %378, %410 : vector<16x32xf32>
    %c0_183 = arith.constant 0 : index
    %c0_184 = arith.constant 0 : index
    %412 = vector.load %arg13[%c0_183, %c0_184] : memref<1x32xf32, #tpu.memory_space<vmem>>, vector<1x32xf32>
    %413 = vector.broadcast %412 : vector<1x32xf32> to vector<16x32xf32>
    %414 = arith.addf %411, %413 : vector<16x32xf32>
    %c0_185 = arith.constant 0 : index
    %c0_186 = arith.constant 0 : index
    %415 = vector.load %arg16[%c0_185, %c0_186] : memref<16x32xf32, #tpu.memory_space<vmem>>, vector<16x32xf32>
    tpu.vector_store %arg16[%c0_185, %c0_186], %414 {strides = array<i32>} : memref<16x32xf32, #tpu.memory_space<vmem>>, vector<16x32xf32>,
    return
  }
  func.func @transform_0(%arg0: i32) -> (i32, i32) {
    %c0_i32 = arith.constant 0 : i32
    %c0_i32_0 = arith.constant 0 : i32
    return %arg0, %c0_i32 : i32, i32
  }
  func.func @transform_1(%arg0: i32) -> (i32, i32, i32) {
    %c0_i32 = arith.constant 0 : i32
    %c0_i32_0 = arith.constant 0 : i32
    %c0_i32_1 = arith.constant 0 : i32
    return %arg0, %c0_i32, %c0_i32_0 : i32, i32, i32
  }
  func.func @transform_2(%arg0: i32) -> (i32, i32, i32) {
    %c0_i32 = arith.constant 0 : i32
    %c0_i32_0 = arith.constant 0 : i32
    %c0_i32_1 = arith.constant 0 : i32
    return %arg0, %c0_i32, %c0_i32_0 : i32, i32, i32
  }
  func.func @transform_3(%arg0: i32) -> (i32, i32, i32) {
    %c0_i32 = arith.constant 0 : i32
    %c0_i32_0 = arith.constant 0 : i32
    %c0_i32_1 = arith.constant 0 : i32
    return %arg0, %c0_i32, %c0_i32_0 : i32, i32, i32
  }
  func.func @transform_4(%arg0: i32) -> (i32, i32) {
    %c0_i32 = arith.constant 0 : i32
    %c0_i32_0 = arith.constant 0 : i32
    %c0_i32_1 = arith.constant 0 : i32
    return %c0_i32, %c0_i32_0 : i32, i32
  }
  func.func @transform_5(%arg0: i32) -> (i32, i32) {
    %c0_i32 = arith.constant 0 : i32
    %c0_i32_0 = arith.constant 0 : i32
    %c0_i32_1 = arith.constant 0 : i32
    return %c0_i32, %c0_i32_0 : i32, i32
  }
  func.func @transform_6(%arg0: i32) -> (i32, i32) {
    %c0_i32 = arith.constant 0 : i32
    %c0_i32_0 = arith.constant 0 : i32
    %c0_i32_1 = arith.constant 0 : i32
    return %c0_i32, %c0_i32_0 : i32, i32
  }
  func.func @transform_7(%arg0: i32) -> (i32, i32) {
    %c0_i32 = arith.constant 0 : i32
    %c0_i32_0 = arith.constant 0 : i32
    %c0_i32_1 = arith.constant 0 : i32
    return %c0_i32, %c0_i32_0 : i32, i32
  }
  func.func @transform_8(%arg0: i32) -> (i32, i32) {
    %c0_i32 = arith.constant 0 : i32
    %c0_i32_0 = arith.constant 0 : i32
    %c0_i32_1 = arith.constant 0 : i32
    return %c0_i32, %c0_i32_0 : i32, i32
  }
  func.func @transform_9(%arg0: i32) -> (i32, i32) {
    %c0_i32 = arith.constant 0 : i32
    %c0_i32_0 = arith.constant 0 : i32
    %c0_i32_1 = arith.constant 0 : i32
    return %c0_i32, %c0_i32_0 : i32, i32
  }
  func.func @transform_10(%arg0: i32) -> (i32, i32) {
    %c0_i32 = arith.constant 0 : i32
    %c0_i32_0 = arith.constant 0 : i32
    %c0_i32_1 = arith.constant 0 : i32
    return %c0_i32, %c0_i32_0 : i32, i32
  }
  func.func @transform_11(%arg0: i32) -> (i32, i32) {
    %c0_i32 = arith.constant 0 : i32
    %c0_i32_0 = arith.constant 0 : i32
    %c0_i32_1 = arith.constant 0 : i32
    return %c0_i32, %c0_i32_0 : i32, i32
  }
  func.func @transform_12(%arg0: i32) -> (i32, i32) {
    %c0_i32 = arith.constant 0 : i32
    %c0_i32_0 = arith.constant 0 : i32
    %c0_i32_1 = arith.constant 0 : i32
    return %c0_i32, %c0_i32_0 : i32, i32
  }
  func.func @transform_13(%arg0: i32) -> (i32, i32) {
    %c0_i32 = arith.constant 0 : i32
    %c0_i32_0 = arith.constant 0 : i32
    %c0_i32_1 = arith.constant 0 : i32
    return %c0_i32, %c0_i32_0 : i32, i32
  }
  func.func @transform_14(%arg0: i32) -> (i32, i32) {
    %c0_i32 = arith.constant 0 : i32
    %c0_i32_0 = arith.constant 0 : i32
    %c0_i32_1 = arith.constant 0 : i32
    return %c0_i32, %c0_i32_0 : i32, i32
  }
  func.func @transform_15(%arg0: i32) -> (i32, i32) {
    %c0_i32 = arith.constant 0 : i32
    %c0_i32_0 = arith.constant 0 : i32
    return %arg0, %c0_i32 : i32, i32
  }
}

</mosaic_0001>

<bundles_post_ra>
// kernel: decoder_block.1
= control target key start
LH: loop header
LB: loop body
LE: loop exit
PB: predicated region body
PF: predicated region fallthrough
CT: control target
= control target key end

     0   :  { %vm55_vm0 = vcmask 261120   ;;  %s5158_s0 = inlined_call_operand.vmem [shape: f32[16,32], index: 0, kind: input, shape index: {}]   ;;  %s5159_s1 = inlined_call_operand.vmem [shape: f32[2,10,32], index: 1, kind: input, shape index: {}]   ;;  %s5160_s2 = inlined_call_operand.vmem [shape: f32[2,8,8], index: 2, kind: input, shape index: {}]   ;;  %s5161_s3 = inlined_call_operand.vmem [shape: f32[2,8,10], index: 3, kind: input, shape index: {}]   ;;  %s5162_s4 = inlined_call_operand.vmem [shape: f32[32,96], index: 4, kind: input, shape index: {}]   ;;  %s5163_s5 = inlined_call_operand.vmem [shape: f32[32,32], index: 5, kind: input, shape index: {}]   ;;  %s5164_s6 = inlined_call_operand.vmem [shape: f32[32,32], index: 6, kind: input, shape index: {}]   ;;  %s5165_s7 = inlined_call_operand.vmem [shape: f32[32,64], index: 7, kind: input, shape index: {}]   ;;  %s5166_s8 = inlined_call_operand.vmem [shape: f32[32,32], index: 8, kind: input, shape index: {}]   ;;  %s5167_s9 = inlined_call_operand.vmem [shape: f32[32,64], index: 9, kind: input, shape index: {}]   ;;  %s5168_s10 = inlined_call_operand.vmem [shape: f32[1,64], index: 10, kind: input, shape index: {}]   ;;  %s5169_s11 = inlined_call_operand.vmem [shape: f32[64,32], index: 11, kind: input, shape index: {}]   ;;  %s5170_s12 = inlined_call_operand.vmem [shape: f32[1,32], index: 12, kind: input, shape index: {}]   ;;  %s5171_s13 = inlined_call_operand.vmem [shape: f32[3,32], index: 13, kind: input, shape index: {}]   ;;  %s5172_s14 = inlined_call_operand.vmem [shape: f32[3,32], index: 14, kind: input, shape index: {}]   ;;  %s5173_s15 = inlined_call_operand.hbm [shape: f32[16,32], index: 15, kind: output, shape index: {}]  }
   0x1   :  { %v4498_v0 = vld [vmem:[%s5158_s0] sm:$0xff]  ;;  %v4503_v1 = vld [vmem:[%s5158_s0 + $0x8] sm:$0xff] }
   0x2   :  { %20 = vsyncpa [#allocation4], 0  ;;  %v56_v2 = vsel %vm55_vm0, %v4498_v0, 0.0  ;;  %v59_v3 = vsel %vm55_vm0, %v4503_v1, 0.0  ;;  %v112_v14 = vld [vmem:[%s5162_s4 + $0x18] sm:$0xff]  ;;  %v111_v15 = vld [vmem:[%s5162_s4 + $0x10] sm:$0xff] }
   0x3   :  { %57 = vadd.xlane.f32.xlu0 %v56_v2  ;;  %3981 = vmatprep.subr.mxu1 %v112_v14  ;;  %v110_v16 = vld [vmem:[%s5162_s4 + $0x8] sm:$0xff]  ;;  %v109_v17 = vld [vmem:[%s5162_s4] sm:$0xff]  ;;  %v4397_v44 = vmov 0.0   ;;  %vm4398_vm5 = vmmov 0   ;;  %s4399_s17 = smov 88   ;;  %s4400_s18 = smov 96  }
   0x4   :  { %3982 = vmatpush3.msra.mxu1 %v112_v14  ;;  %v3757_v34 = vld [vmem:[%s5171_s13] ss:$0 sm:$0xff]  ;;  %4002 = vmatprep.subr.mxu0 %v4397_v44  ;;  %s4401_s19 = smov 120   ;;  %s4402_s20 = smov 112   ;;  %vm198_vm6 = vcmask 64512   ;;  %vm534_vm7 = vcmask 130112  }
   0x5   :  { %3983 = vmatprep.subr.mxu1 %v111_v15  ;;  %v3758_v37 = vld [vmem:[%s5172_s14] ss:$0 sm:$0xff]  ;;  %4004 = vmatprep.mubr.msk.f32.mxu0 %vm4398_vm5, %v4397_v44  ;;  %s4403_s21 = smov 80   ;;  %s4404_s0 = smov 104   ;;  %vm707_vm8 = vcmask 195712   ;;  %vm880_vm9 = vcmask 261312  }
   0x6   :  { %3984 = vmatpush3.msra.mxu1 %v111_v15  ;;  %s4405_s22 = smov 72   ;;  %v194_v62 = vld [vmem:[%s5160_s2] sm:$0xff]  ;;  %s4407_s27 = smov 48   ;;  %vm1964_vm14 = vcmask 80896   ;;  %vm1984_vm15 = vcmask 1041408  }
   0x7   :  { %60 = vadd.xlane.f32.xlu0 %v59_v3  ;;  %3985 = vmatprep.subr.mxu1 %v110_v16  ;;  %s4408_s28 = smov 40   ;;  %s4409_s4 = smov 56  }
   0x8   :  { %3986 = vmatpush3.msra.mxu1 %v110_v16  ;;  %s4410_s29 = smov 8   ;;  %s4411_s30 = smov 16  }
   0x9   :  { %3987 = vmatprep.subr.mxu1 %v109_v17  ;;  %s4412_s16 = smov 24  }
   0xa   :  { %3988 = vmatpush3.msra.mxu1 %v109_v17 }
   0xb   :  { %3992 = vmatprep.subr.mxu1 %v4397_v44 }
  0x8c   :  { %v58_v4 = vpop.xlane.xlu0 %57 }
  0x8d   :  { %v63_v5 = vmul.f32 0.03125, %v58_v4 }
  0x8f   :  { %v65_v6 = vsub.f32 %v4498_v0, %v63_v5 }
  0x90   :  { %v61_v7 = vpop.xlane.xlu0 %60 }
  0x91   :  { %v64_v8 = vmul.f32 0.03125, %v61_v7  ;;  %v67_v9 = vmul.f32 %v65_v6, %v65_v6  ;;  %v99_v35 = vmul.f32 %v3757_v34, %v65_v6 }
  0x93   :  { %v66_v10 = vsub.f32 %v4503_v1, %v64_v8  ;;  %v69_v11 = vsel %vm55_vm0, %v67_v9, 0.0 }
  0x94   :  { %70 = vadd.xlane.f32.xlu1 %v69_v11 }
  0x95   :  { %v68_v12 = vmul.f32 %v66_v10, %v66_v10  ;;  %v100_v39 = vmul.f32 %v3757_v34, %v66_v10 }
  0x97   :  { %v72_v13 = vsel %vm55_vm0, %v68_v12, 0.0 }
  0x98   :  { %73 = vadd.xlane.f32.xlu1 %v72_v13 }
 0x11d   :  { %v71_v18 = vpop.xlane.xlu1 %70 }
 0x11e   :  { %v75_v19 = vmul.f32 0.032258064, %v71_v18 }
 0x120   :  { %4287 = vrsqrt.f32 %v75_v19  ;;  %vm79_vm1 = vcmp.eq.f32.partialorder %v75_v19, inf  ;;  %v82_v24 = vand.u32 2147483648, %v75_v19  ;;  %vm81_vm2 = vcmp.eq.f32.partialorder %v75_v19, 0.0 }
 0x121   :  { %v74_v20 = vpop.xlane.xlu1 %73 }
 0x122   :  { %v76_v21 = vmul.f32 0.032258064, %v74_v20  ;;  %v3773_v20 = vld [vmem:[%s5160_s2 + $0x8] sm:$0xff]  ;;  %s4406_s2 = smov 64  }
 0x124   :  { %4289 = vrsqrt.f32 %v76_v21  ;;  %vm86_vm3 = vcmp.eq.f32.partialorder %v76_v21, inf  ;;  %v89_v30 = vand.u32 2147483648, %v76_v21  ;;  %vm88_vm4 = vcmp.eq.f32.partialorder %v76_v21, 0.0 }
 0x12d   :  { %v4288_v22 = vpop.eup %4287 }
 0x12e   :  { %v78_v23 = vmul.f32 %v4288_v22, %v75_v19 }
 0x130   :  { %v80_v25 = vsel %vm79_vm1, %v75_v19, %v78_v23 }
 0x131   :  { %v4290_v26 = vpop.eup %4289  ;;  %v83_v27 = vsel %vm81_vm2, %v82_v24, %v80_v25 }
 0x132   :  { %v85_v28 = vmul.f32 %v4290_v26, %v76_v21  ;;  %v91_v29 = vadd.f32 1e-06, %v83_v27 }
 0x134   :  { %v87_v31 = vsel %vm86_vm3, %v76_v21, %v85_v28  ;;  %4291 = vrcp.f32 %v91_v29 }
 0x135   :  { %v90_v32 = vsel %vm88_vm4, %v89_v30, %v87_v31 }
 0x136   :  { %v92_v33 = vadd.f32 1e-06, %v90_v32 }
 0x138   :  { %4293 = vrcp.f32 %v92_v33 }
 0x141   :  { %v4292_v36 = vpop.eup %4291 }
 0x142   :  { %v101_v38 = vmul.f32 %v4292_v36, %v99_v35 }
 0x144   :  { %v107_v40 = vadd.f32 %v3758_v37, %v101_v38 }
 0x145   :  { %v4294_v41 = vpop.eup %4293 }
 0x146   :  { %v102_v42 = vmul.f32 %v4294_v41, %v100_v39  ;;  %3989 = vmatprep.mubr.msk.f32.mxu1 %vm55_vm0, %v107_v40 }
 0x148   :  { %v108_v43 = vadd.f32 %v3758_v37, %v102_v42 }
 0x14a   :  { %3990 = vmatmul.mubr.msk.f32.vlgmr.msra.gmra.mxu1 %vm55_vm0, %v108_v43 }
 0x14b   :  { %3994 = vmatprep.mubr.msk.f32.mxu1 %vm4398_vm5, %v4397_v44 }
 0x20a   :  { %v4539_v45 = vpop.f32.mrf.mxu1 }
 0x20c   :  { %v4541_v46 = vpop.f32.mrf.mxu1 }
 0x20d   :  { %365 = vrot.lane.b32.xlu1 %v4541_v46, %s4399_s17  ;;  %196 = vrot.lane.b32.xlu0 %v4541_v46, %s4400_s18 }
 0x211   :  { %363 = vrot.lane.b32.xlu1 %v4541_v46, %s4401_s19  ;;  %536 = vrot.lane.b32.xlu0 %v4541_v46, %s4402_s20 }
 0x215   :  { %538 = vrot.lane.b32.xlu1 %v4541_v46, %s4403_s21  ;;  %709 = vrot.lane.b32.xlu0 %v4541_v46, %s4404_s0 }
 0x219   :  { %711 = vrot.lane.b32.xlu1 %v4541_v46, %s4405_s22  ;;  %1053 = vrot.lane.b32.xlu0 %v4539_v45, %s4399_s17 }
 0x21d   :  { %885 = vrot.lane.b32.xlu1 %v4539_v45, %s4400_s18  ;;  %1225 = vrot.lane.b32.xlu0 %v4539_v45, %s4403_s21 }
 0x221   :  { %1051 = vrot.lane.b32.xlu1 %v4539_v45, %s4401_s19  ;;  %1397 = vrot.lane.b32.xlu0 %v4539_v45, %s4405_s22 }
 0x225   :  { %1223 = vrot.lane.b32.xlu1 %v4539_v45, %s4402_s20 }
 0x229   :  { %1395 = vrot.lane.b32.xlu1 %v4539_v45, %s4404_s0 }
 0x27f   :  { %v366_v47 = vpop.permute.xlu1 %365  ;;  %v197_v48 = vpop.permute.xlu0 %196 }
 0x280   :  { %3993 = vmatpush3.xpose.msk.msra.mxu1 %vm198_vm6, %v197_v48  ;;  %4003 = vmatpush3.xpose.msk.msra.mxu0 %vm198_vm6, %v366_v47 }
 0x281   :  { %4012 = vmatprep.subr.mxu0 %v4397_v44  ;;  %3997 = vmatprep.subr.mxu1 %v4397_v44 }
 0x283   :  { %v364_v49 = vpop.permute.xlu1 %363  ;;  %3995 = vmatmul.mubr.msk.f32.vlgmr.msra.gmra.mxu1 %vm198_vm6, %v4541_v46  ;;  %v537_v50 = vpop.permute.xlu0 %536 }
 0x284   :  { %4005 = vmatmul.mubr.msk.f32.vlgmr.msra.gmra.mxu0 %vm198_vm6, %v364_v49  ;;  %3999 = vmatprep.mubr.msk.f32.mxu1 %vm4398_vm5, %v4397_v44 }
 0x285   :  { %4014 = vmatprep.mubr.msk.f32.mxu0 %vm4398_vm5, %v4397_v44 }
 0x287   :  { %v539_v51 = vpop.permute.xlu1 %538  ;;  %v710_v52 = vpop.permute.xlu0 %709 }
 0x288   :  { %4013 = vmatpush3.xpose.msk.msra.mxu0 %vm198_vm6, %v539_v51 }
 0x289   :  { %4022 = vmatprep.subr.mxu0 %v4397_v44 }
 0x28b   :  { %v712_v53 = vpop.permute.xlu1 %711  ;;  %4015 = vmatmul.mubr.msk.f32.vlgmr.msra.gmra.mxu0 %vm198_vm6, %v537_v50  ;;  %v1054_v54 = vpop.permute.xlu0 %1053 }
 0x28c   :  { %4023 = vmatpush3.xpose.msk.msra.mxu0 %vm198_vm6, %v712_v53  ;;  %4024 = vmatprep.mubr.msk.f32.mxu0 %vm4398_vm5, %v4397_v44 }
 0x28d   :  { %4032 = vmatprep.subr.mxu0 %v4397_v44 }
 0x28f   :  { %v886_v55 = vpop.permute.xlu1 %885  ;;  %4025 = vmatmul.mubr.msk.f32.vlgmr.msra.gmra.mxu0 %vm198_vm6, %v710_v52  ;;  %v1226_v57 = vpop.permute.xlu0 %1225 }
 0x290   :  { %4033 = vmatpush3.xpose.msk.msra.mxu0 %vm198_vm6, %v886_v55  ;;  %4034 = vmatprep.mubr.msk.f32.mxu0 %vm4398_vm5, %v4397_v44 }
 0x291   :  { %4042 = vmatprep.subr.mxu0 %v4397_v44 }
 0x293   :  { %v1052_v56 = vpop.permute.xlu1 %1051  ;;  %4035 = vmatmul.mubr.msk.f32.vlgmr.msra.gmra.mxu0 %vm198_vm6, %v4539_v45  ;;  %v1398_v59 = vpop.permute.xlu0 %1397 }
 0x294   :  { %4043 = vmatpush3.xpose.msk.msra.mxu0 %vm198_vm6, %v1054_v54  ;;  %4044 = vmatprep.mubr.msk.f32.mxu0 %vm4398_vm5, %v4397_v44 }
 0x295   :  { %4052 = vmatprep.subr.mxu0 %v4397_v44 }
 0x297   :  { %4045 = vmatmul.mubr.msk.f32.vlgmr.msra.gmra.mxu0 %vm198_vm6, %v1052_v56  ;;  %v1224_v58 = vpop.permute.xlu1 %1223 }
 0x298   :  { %4053 = vmatpush3.xpose.msk.msra.mxu0 %vm198_vm6, %v1226_v57  ;;  %4054 = vmatprep.mubr.msk.f32.mxu0 %vm4398_vm5, %v4397_v44 }
 0x299   :  { %4062 = vmatprep.subr.mxu0 %v4397_v44 }
 0x29b   :  { %4055 = vmatmul.mubr.msk.f32.vlgmr.msra.gmra.mxu0 %vm198_vm6, %v1224_v58  ;;  %v1396_v60 = vpop.permute.xlu1 %1395 }
 0x29c   :  { %4063 = vmatpush3.xpose.msk.msra.mxu0 %vm198_vm6, %v1398_v59  ;;  %4064 = vmatprep.mubr.msk.f32.mxu0 %vm4398_vm5, %v4397_v44 }
 0x29f   :  { %4065 = vmatmul.mubr.msk.f32.vlgmr.msra.gmra.mxu0 %vm198_vm6, %v1396_v60 }
 0x343   :  { %v269_v61 = vpop.f32.mrf.mxu1 }
 0x344   :  { %v273_v63 = vmul.f32 0.35355338, %v269_v61  ;;  %v437_v2 = vpop.f32.mrf.mxu0 }
 0x345   :  { %v441_v3 = vmul.f32 0.35355338, %v437_v2  ;;  %v3996_v4 = vpop.f32.mrf.mxu1 }
 0x346   :  { %v4006_v5 = vpop.f32.mrf.mxu0  ;;  %v274_v6 = vadd.f32 %v273_v63, %v194_v62 }
 0x347   :  { %v442_v7 = vadd.f32 %v441_v3, %v194_v62 }
 0x348   :  { %v275_v8 = vsel %vm198_vm6, %v274_v6, -inf }
 0x349   :  { %276 = vmax.xlane.f32.xlu0 %v275_v8  ;;  %v443_v9 = vsel %vm198_vm6, %v442_v7, -inf }
 0x34a   :  { %444 = vmax.xlane.f32.xlu1 %v443_v9 }
 0x34b   :  { %v610_v10 = vpop.f32.mrf.mxu0 }
 0x34c   :  { %v614_v11 = vmul.f32 0.35355338, %v610_v10 }
 0x34d   :  { %v4016_v12 = vpop.f32.mrf.mxu0 }
 0x34e   :  { %v4615_v13 = vadd.f32 %v614_v11, %v194_v62 }
 0x34f   :  { %v783_v14 = vpop.f32.mrf.mxu0 }
 0x350   :  { %v787_v15 = vmul.f32 0.35355338, %v783_v14  ;;  %v616_v16 = vsel %vm198_vm6, %v4615_v13, -inf }
 0x351   :  { %617 = vmax.xlane.f32.xlu0 %v616_v16  ;;  %v4026_v17 = vpop.f32.mrf.mxu0 }
 0x352   :  { %v788_v18 = vadd.f32 %v787_v15, %v194_v62 }
 0x353   :  { %v957_v19 = vpop.f32.mrf.mxu0 }
 0x354   :  { %v961_v21 = vmul.f32 0.35355338, %v957_v19  ;;  %v789_v22 = vsel %vm198_vm6, %v788_v18, -inf }
 0x355   :  { %790 = vmax.xlane.f32.xlu0 %v789_v22  ;;  %v4036_v23 = vpop.f32.mrf.mxu0 }
 0x356   :  { %v4623_v24 = vadd.f32 %v3773_v20, %v961_v21 }
 0x357   :  { %v1125_v25 = vpop.f32.mrf.mxu0 }
 0x358   :  { %v1129_v26 = vmul.f32 0.35355338, %v1125_v25  ;;  %v963_v27 = vsel %vm198_vm6, %v4623_v24, -inf }
 0x359   :  { %964 = vmax.xlane.f32.xlu0 %v963_v27  ;;  %v4046_v28 = vpop.f32.mrf.mxu0 }
 0x35a   :  { %v1130_v29 = vadd.f32 %v3773_v20, %v1129_v26 }
 0x35b   :  { %v1297_v30 = vpop.f32.mrf.mxu0 }
 0x35c   :  { %v1301_v31 = vmul.f32 0.35355338, %v1297_v30  ;;  %v1131_v32 = vsel %vm198_vm6, %v1130_v29, -inf }
 0x35d   :  { %1132 = vmax.xlane.f32.xlu1 %v1131_v32  ;;  %v4056_v33 = vpop.f32.mrf.mxu0 }
 0x35e   :  { %v1302_v34 = vadd.f32 %v3773_v20, %v1301_v31 }
 0x35f   :  { %v1469_v35 = vpop.f32.mrf.mxu0 }
 0x360   :  { %v1303_v36 = vsel %vm198_vm6, %v1302_v34, -inf  ;;  %v1473_v38 = vmul.f32 0.35355338, %v1469_v35 }
 0x361   :  { %1304 = vmax.xlane.f32.xlu0 %v1303_v36  ;;  %v4066_v37 = vpop.f32.mrf.mxu0 }
 0x362   :  { %v1474_v39 = vadd.f32 %v3773_v20, %v1473_v38 }
 0x364   :  { %v1475_v40 = vsel %vm198_vm6, %v1474_v39, -inf }
 0x36e   :  { %286 = vrot.lane.b32.xlu1 %v4541_v46, %s4406_s2 }
 0x392   :  { %1476 = vmax.xlane.f32.xlu1 %v1475_v40 }
 0x3a3   :  { %627 = vrot.lane.b32.xlu1 %v4541_v46, %s4407_s27 }
 0x3a7   :  { %800 = vrot.lane.b32.xlu1 %v4541_v46, %s4408_s28 }
 0x3ab   :  { %974 = vrot.lane.b32.xlu1 %v4539_v45, %s4406_s2 }
 0x3d2   :  { %v277_v41 = vpop.xlane.xlu0 %276 }
 0x3d3   :  { %v278_v42 = vsub.f32 %v274_v6, %v277_v41  ;;  %v445_v43 = vpop.xlane.xlu1 %444 }
 0x3d4   :  { %v446_v47 = vsub.f32 %v442_v7, %v445_v43 }
 0x3d5   :  { %v279_v48 = vmul.f32 1.442695, %v278_v42 }
 0x3d6   :  { %v447_v49 = vmul.f32 1.442695, %v446_v47 }
 0x3d7   :  { %4295 = vpow2.f32 %v279_v48 }
 0x3d8   :  { %4297 = vpow2.f32 %v447_v49 }
 0x3da   :  { %v618_v50 = vpop.xlane.xlu0 %617 }
 0x3db   :  { %v619_v62 = vsub.f32 %v4615_v13, %v618_v50 }
 0x3dd   :  { %v620_v2 = vmul.f32 1.442695, %v619_v62 }
 0x3de   :  { %v791_v51 = vpop.xlane.xlu0 %790 }
 0x3df   :  { %v792_v52 = vsub.f32 %v788_v18, %v791_v51 }
 0x3e1   :  { %v793_v53 = vmul.f32 1.442695, %v792_v52 }
 0x3e2   :  { %v965_v63 = vpop.xlane.xlu0 %964 }
 0x3e3   :  { %4299 = vpow2.f32 %v793_v53  ;;  %v966_v3 = vsub.f32 %v4623_v24, %v965_v63 }
 0x3e4   :  { %v4296_v54 = vpop.eup %4295  ;;  %4301 = vpow2.f32 %v620_v2  ;;  %v1572_v2 = vld [vmem:[%s5163_s5 + $0x18] sm:$0xff] }
 0x3e5   :  { %v4636_v55 = vpop.eup %4297  ;;  %v281_v56 = vsel %vm198_vm6, %v4296_v54, 0.0  ;;  %v967_v5 = vmul.f32 1.442695, %v966_v3  ;;  %v1571_v3 = vld [vmem:[%s5163_s5 + $0x10] sm:$0xff]  ;;  %4072 = vmatprep.subr.mxu0 %v1572_v2 }
 0x3e6   :  { %v1133_v57 = vpop.xlane.xlu1 %1132  ;;  %282 = vadd.xlane.f32.xlu0 %v281_v56  ;;  %v449_v58 = vsel %vm198_vm6, %v4636_v55, 0.0  ;;  %4073 = vmatpush3.msra.mxu0 %v1572_v2 }
 0x3e7   :  { %450 = vadd.xlane.f32.xlu1 %v449_v58  ;;  %4303 = vpow2.f32 %v967_v5  ;;  %v1134_v7 = vsub.f32 %v1130_v29, %v1133_v57  ;;  %v1570_v5 = vld [vmem:[%s5163_s5 + $0x8] sm:$0xff]  ;;  %4074 = vmatprep.subr.mxu0 %v1571_v3 }
 0x3e8   :  { %4075 = vmatpush3.msra.mxu0 %v1571_v3  ;;  %v3789_v3 = vld [vmem:[%s5172_s14 + $0x1] ss:$0 sm:$0xff] }
 0x3e9   :  { %v1135_v9 = vmul.f32 1.442695, %v1134_v7  ;;  %v1569_v7 = vld [vmem:[%s5163_s5] sm:$0xff]  ;;  %4076 = vmatprep.subr.mxu0 %v1570_v5 }
 0x3ea   :  { %v287_v59 = vpop.permute.xlu1 %286  ;;  %v1305_v4 = vpop.xlane.xlu0 %1304  ;;  %4077 = vmatpush3.msra.mxu0 %v1570_v5 }
 0x3eb   :  { %3998 = vmatpush3.msra.mxu1 %v287_v59  ;;  %v1306_v6 = vsub.f32 %v1302_v34, %v1305_v4  ;;  %4078 = vmatprep.subr.mxu0 %v1569_v7 }
 0x3ec   :  { %4007 = vmatprep.subr.mxu1 %v4397_v44  ;;  %4079 = vmatpush3.msra.mxu0 %v1569_v7 }
 0x3ed   :  { %v1307_v8 = vmul.f32 1.442695, %v1306_v6 }
 0x3ef   :  { %4305 = vpow2.f32 %v1307_v8 }
 0x3f0   :  { %v4642_v60 = vpop.eup %4299  ;;  %4307 = vpow2.f32 %v1135_v9 }
 0x3f1   :  { %v795_v61 = vsel %vm198_vm6, %v4642_v60, 0.0  ;;  %v4302_v10 = vpop.eup %4301 }
 0x3f2   :  { %796 = vadd.xlane.f32.xlu1 %v795_v61 }
 0x3f4   :  { %v4651_v11 = vpop.eup %4303 }
 0x3f5   :  { %v969_v15 = vsel %vm198_vm6, %v4651_v11, 0.0 }
 0x3fc   :  { %454 = vrot.lane.b32.xlu0 %v4541_v46, %s4409_s4  ;;  %v622_v46 = vsel %vm198_vm6, %v4302_v10, 0.0  ;;  %v4655_v16 = vpop.eup %4305 }
 0x3fd   :  { %v1309_v17 = vsel %vm198_vm6, %v4655_v16, 0.0  ;;  %v4308_v18 = vpop.eup %4307 }
 0x3fe   :  { %v1137_v19 = vsel %vm198_vm6, %v4308_v18, 0.0 }
 0x403   :  { %1142 = vrot.lane.b32.xlu1 %v4539_v45, %s4409_s4 }
 0x41b   :  { %v1477_v12 = vpop.xlane.xlu1 %1476  ;;  %623 = vadd.xlane.f32.xlu0 %v622_v46 }
 0x41c   :  { %v1478_v13 = vsub.f32 %v1474_v39, %v1477_v12 }
 0x41e   :  { %v1479_v14 = vmul.f32 1.442695, %v1478_v13 }
 0x41f   :  { %970 = vadd.xlane.f32.xlu0 %v969_v15  ;;  %v628_v22 = vpop.permute.xlu1 %627 }
 0x420   :  { %4309 = vpow2.f32 %v1479_v14 }
 0x423   :  { %1310 = vadd.xlane.f32.xlu0 %v1309_v17  ;;  %v801_v23 = vpop.permute.xlu1 %800 }
 0x427   :  { %1138 = vadd.xlane.f32.xlu1 %v1137_v19  ;;  %v975_v24 = vpop.permute.xlu1 %974 }
 0x42d   :  { %v4660_v20 = vpop.eup %4309 }
 0x42e   :  { %v1481_v21 = vsel %vm198_vm6, %v4660_v20, 0.0 }
 0x42f   :  { %1482 = vadd.xlane.f32.xlu0 %v1481_v21 }
 0x438   :  { %1486 = vrot.lane.b32.xlu1 %v4539_v45, %s4408_s28 }
 0x445   :  { %1314 = vrot.lane.b32.xlu0 %v4539_v45, %s4407_s27 }
 0x46f   :  { %v283_v25 = vpop.xlane.xlu0 %282 }
 0x470   :  { %4311 = vrcp.f32 %v283_v25  ;;  %v451_v26 = vpop.xlane.xlu1 %450 }
 0x471   :  { %4313 = vrcp.f32 %v451_v26 }
 0x473   :  { %v455_v30 = vpop.permute.xlu0 %454 }
 0x47b   :  { %v797_v31 = vpop.xlane.xlu1 %796 }
 0x47d   :  { %v4312_v27 = vpop.eup %4311 }
 0x47e   :  { %v285_v28 = vmul.f32 %v4312_v27, %v4296_v54  ;;  %v4314_v29 = vpop.eup %4313 }
 0x47f   :  { %v453_v45 = vmul.f32 %v4314_v29, %v4636_v55  ;;  %v1143_v34 = vpop.permute.xlu1 %1142 }
 0x480   :  { %4000 = vmatmul.mubr.msk.f32.vlgmr.msra.gmra.mxu1 %vm198_vm6, %v285_v28 }
 0x481   :  { %4008 = vmatpush3.msra.mxu1 %v455_v30  ;;  %4009 = vmatprep.mubr.msk.f32.mxu1 %vm4398_vm5, %v4397_v44 }
 0x482   :  { %4017 = vmatprep.subr.mxu1 %v4397_v44 }
 0x484   :  { %4010 = vmatmul.mubr.msk.f32.vlgmr.msra.gmra.mxu1 %vm198_vm6, %v453_v45 }
 0x485   :  { %4018 = vmatpush3.msra.mxu1 %v628_v22  ;;  %4019 = vmatprep.mubr.msk.f32.mxu1 %vm4398_vm5, %v4397_v44 }
 0x486   :  { %4027 = vmatprep.subr.mxu1 %v4397_v44 }
 0x4a4   :  { %v624_v32 = vpop.xlane.xlu0 %623 }
 0x4a5   :  { %4315 = vrcp.f32 %v624_v32 }
 0x4a6   :  { %4317 = vrcp.f32 %v797_v31 }
 0x4a8   :  { %v971_v33 = vpop.xlane.xlu0 %970 }
 0x4a9   :  { %4319 = vrcp.f32 %v971_v33  ;;  %v4754_v33 = vld [vmem:[%s5165_s7 + $0x18] sm:$0xff] }
 0x4aa   :  { %4094 = vmatprep.subr.mxu0 %v4754_v33 }
 0x4ac   :  { %v1311_v35 = vpop.xlane.xlu0 %1310 }
 0x4b0   :  { %v1139_v36 = vpop.xlane.xlu1 %1138 }
 0x4b1   :  { %4321 = vrcp.f32 %v1139_v36  ;;  %v1713_v36 = vld [vmem:[%s5164_s6 + $0x18] sm:$0xff] }
 0x4b2   :  { %v4316_v37 = vpop.eup %4315  ;;  %4323 = vrcp.f32 %v1311_v35  ;;  %v1795_v35 = vld [vmem:[%s5159_s1] sm:$0xff] }
 0x4b3   :  { %v626_v38 = vmul.f32 %v4316_v37, %v4302_v10  ;;  %v4318_v39 = vpop.eup %4317  ;;  %v4772_v37 = vld [vmem:[%s5165_s7 + $0x8] sm:$0xff] }
 0x4b4   :  { %v799_v40 = vmul.f32 %v4318_v39, %v4642_v60  ;;  %v1487_v52 = vpop.permute.xlu1 %1486  ;;  %v4783_v39 = vld [vmem:[%s5165_s7] sm:$0xff] }
 0x4b5   :  { %4020 = vmatmul.mubr.msk.f32.vlgmr.msra.gmra.mxu1 %vm198_vm6, %v626_v38  ;;  %v1712_v38 = vld [vmem:[%s5164_s6 + $0x10] sm:$0xff] }
 0x4b6   :  { %4028 = vmatpush3.msra.mxu1 %v801_v23  ;;  %4029 = vmatprep.mubr.msk.f32.mxu1 %vm4398_vm5, %v4397_v44  ;;  %v4320_v41 = vpop.eup %4319 }
 0x4b7   :  { %4037 = vmatprep.subr.mxu1 %v4397_v44  ;;  %v973_v43 = vmul.f32 %v4320_v41, %v4651_v11  ;;  %v1796_v41 = vld [vmem:[%s5159_s1 + $0x8] sm:$0x3] }
 0x4b8   :  { %v1483_v42 = vpop.xlane.xlu0 %1482 }
 0x4b9   :  { %4325 = vrcp.f32 %v1483_v42  ;;  %4030 = vmatmul.mubr.msk.f32.vlgmr.msra.gmra.mxu1 %vm198_vm6, %v799_v40  ;;  %v1711_v40 = vld [vmem:[%s5164_s6 + $0x8] sm:$0xff]  ;;  %v1710_v42 = vld [vmem:[%s5164_s6] sm:$0xff] }
 0x4ba   :  { %4038 = vmatpush3.msra.mxu1 %v975_v24  ;;  %4039 = vmatprep.mubr.msk.f32.mxu1 %vm4398_vm5, %v4397_v44 }
 0x4bb   :  { %4047 = vmatprep.subr.mxu1 %v4397_v44 }
 0x4bc   :  { %v1315_v50 = vpop.permute.xlu0 %1314 }
 0x4bd   :  { %4040 = vmatmul.mubr.msk.f32.vlgmr.msra.gmra.mxu1 %vm198_vm6, %v973_v43 }
 0x4be   :  { %v4322_v47 = vpop.eup %4321  ;;  %4048 = vmatpush3.msra.mxu1 %v1143_v34  ;;  %4049 = vmatprep.mubr.msk.f32.mxu1 %vm4398_vm5, %v4397_v44  ;;  %v4759_v34 = vld [vmem:[%s5165_s7 + $0x10] sm:$0xff] }
 0x4bf   :  { %4057 = vmatprep.subr.mxu1 %v4397_v44  ;;  %v1141_v48 = vmul.f32 %v4322_v47, %v4308_v18  ;;  %v4324_v49 = vpop.eup %4323 }
 0x4c0   :  { %v1313_v51 = vmul.f32 %v4324_v49, %v4655_v16 }
 0x4c1   :  { %4050 = vmatmul.mubr.msk.f32.vlgmr.msra.gmra.mxu1 %vm198_vm6, %v1141_v48 }
 0x4c2   :  { %4058 = vmatpush3.msra.mxu1 %v1315_v50  ;;  %4059 = vmatprep.mubr.msk.f32.mxu1 %vm4398_vm5, %v4397_v44 }
 0x4c3   :  { %4067 = vmatprep.subr.mxu1 %v4397_v44 }
 0x4c5   :  { %4060 = vmatmul.mubr.msk.f32.vlgmr.msra.gmra.mxu1 %vm198_vm6, %v1313_v51 }
 0x4c6   :  { %v4326_v53 = vpop.eup %4325  ;;  %4068 = vmatpush3.msra.mxu1 %v1487_v52  ;;  %4069 = vmatprep.mubr.msk.f32.mxu1 %vm4398_vm5, %v4397_v44 }
 0x4c7   :  { %v1485_v54 = vmul.f32 %v4326_v53, %v4660_v20  ;;  %4083 = vmatprep.subr.mxu1 %v1713_v36 }
 0x4c9   :  { %4070 = vmatmul.mubr.msk.f32.vlgmr.msra.gmra.mxu1 %vm198_vm6, %v1485_v54 }
 0x4ca   :  { %4084 = vmatpush3.msra.mxu1 %v1713_v36 }
 0x4cb   :  { %4085 = vmatprep.subr.mxu1 %v1712_v38 }
 0x4cc   :  { %4086 = vmatpush3.msra.mxu1 %v1712_v38 }
 0x4cd   :  { %4087 = vmatprep.subr.mxu1 %v1711_v40 }
 0x4ce   :  { %4088 = vmatpush3.msra.mxu1 %v1711_v40 }
 0x4cf   :  { %4089 = vmatprep.subr.mxu1 %v1710_v42 }
 0x4d0   :  { %4090 = vmatpush3.msra.mxu1 %v1710_v42 }
 0x4d1   :  { %4105 = vmatprep.subr.mxu1 %v4397_v44 }
 0x540   :  { %v358_v55 = vpop.f32.mrf.mxu1 }
 0x541   :  { %362 = vst.msk [vmem:[#allocation2] sm:$0xff] %vm198_vm6, %v358_v55 }
 0x542   :  { %v4001_v56 = vpop.f32.mrf.mxu1 }
 0x544   :  { %v526_v57 = vpop.f32.mrf.mxu1 }
 0x545   :  { %531 = vrot.lane.b32.xlu0 %v526_v57, %s4410_s29 }
 0x546   :  { %v4011_v58 = vpop.f32.mrf.mxu1 }
 0x575   :  { %v699_v59 = vpop.f32.mrf.mxu1 }
 0x576   :  { %704 = vrot.lane.b32.xlu1 %v699_v59, %s4411_s30 }
 0x577   :  { %v4021_v60 = vpop.f32.mrf.mxu1 }
 0x579   :  { %v872_v61 = vpop.f32.mrf.mxu1 }
 0x57a   :  { %877 = vrot.lane.b32.xlu1 %v872_v61, %s4412_s16 }
 0x57b   :  { %v4031_v62 = vpop.f32.mrf.mxu1 }
 0x57c   :  { %v3788_v62 = vld [vmem:[%s5171_s13 + $0x1] ss:$0 sm:$0xff] }
 0x57d   :  { %v1046_v63 = vpop.f32.mrf.mxu1 }
 0x57e   :  { %1050 = vst.msk [vmem:[#allocation2 + $0x8] sm:$0xff] %vm198_vm6, %v1046_v63 }
 0x57f   :  { %v4041_v4 = vpop.f32.mrf.mxu1 }
 0x581   :  { %v1214_v6 = vpop.f32.mrf.mxu1 }
 0x582   :  { %1219 = vrot.lane.b32.xlu0 %v1214_v6, %s4410_s29 }
 0x583   :  { %v4051_v8 = vpop.f32.mrf.mxu1 }
 0x585   :  { %v1386_v9 = vpop.f32.mrf.mxu1 }
 0x586   :  { %1391 = vrot.lane.b32.xlu0 %v1386_v9, %s4411_s30 }
 0x587   :  { %v4061_v10 = vpop.f32.mrf.mxu1 }
 0x589   :  { %v1558_v46 = vpop.f32.mrf.mxu1 }
 0x58a   :  { %1563 = vrot.lane.b32.xlu1 %v1558_v46, %s4412_s16 }
 0x58b   :  { %v4071_v11 = vpop.f32.mrf.mxu1 }
 0x5b7   :  { %v532_v12 = vpop.permute.xlu0 %531 }
 0x5b8   :  { %535 = vst.msk [vmem:[#allocation2] sm:$0xff] %vm534_vm7, %v532_v12 }
 0x5e8   :  { %v705_v13 = vpop.permute.xlu1 %704 }
 0x5e9   :  { %708 = vst.msk [vmem:[#allocation2] sm:$0xff] %vm707_vm8, %v705_v13 }
 0x5ec   :  { %v878_v14 = vpop.permute.xlu1 %877 }
 0x5ed   :  { %881 = vst.msk [vmem:[#allocation2] sm:$0xff] %vm880_vm9, %v878_v14 }
 0x5f4   :  { %v1220_v15 = vpop.permute.xlu0 %1219  ;;  %v1567_v16 = vld [vmem:[#allocation2] sm:$0xff] }
 0x5f5   :  { %1222 = vst.msk [vmem:[#allocation2 + $0x8] sm:$0xff] %vm534_vm7, %v1220_v15  ;;  %4080 = vmatprep.mubr.msk.f32.mxu0 %vm55_vm0, %v1567_v16 }
 0x5f8   :  { %v1392_v17 = vpop.permute.xlu0 %1391 }
 0x5f9   :  { %1394 = vst.msk [vmem:[#allocation2 + $0x8] sm:$0xff] %vm707_vm8, %v1392_v17  ;;  %v4849_v17 = vld [vmem:[%s5161_s3] sm:$0xff] }
 0x5fc   :  { %v1564_v18 = vpop.permute.xlu1 %1563 }
 0x5fd   :  { %1566 = vst.msk [vmem:[#allocation2 + $0x8] sm:$0xff] %vm880_vm9, %v1564_v18 }
 0x604   :  { %v1568_v19 = vld [vmem:[#allocation2 + $0x8] sm:$0xff] }
 0x605   :  { %4081 = vmatmul.mubr.msk.f32.vlgmr.msra.gmra.mxu0 %vm55_vm0, %v1568_v19 }
 0x606   :  { %4095 = vmatpush3.msra.mxu0 %v4754_v33  ;;  %4102 = vmatprep.mubr.msk.f32.mxu0 %vm55_vm0, %v1795_v35 }
 0x607   :  { %4096 = vmatprep.subr.mxu0 %v4759_v34 }
 0x608   :  { %4097 = vmatpush3.msra.mxu0 %v4759_v34 }
 0x609   :  { %4098 = vmatprep.subr.mxu0 %v4772_v37 }
 0x60a   :  { %4099 = vmatpush3.msra.mxu0 %v4772_v37 }
 0x60b   :  { %4100 = vmatprep.subr.mxu0 %v4783_v39 }
 0x60c   :  { %4101 = vmatpush3.msra.mxu0 %v4783_v39 }
 0x60d   :  { %4103 = vmatmul.mubr.msk.f32.vlgmr.msra.gmra.mxu0 %vm55_vm0, %v1796_v41  ;;  %4112 = vmatprep.subr.mxu0 %v4397_v44 }
 0x60e   :  { %4116 = vmatprep.mubr.msk.f32.mxu0 %vm4398_vm5, %v4397_v44 }
 0x6c5   :  { %v4082_v20 = vpop.f32.mrf.mxu0 }
 0x6c6   :  { %v4730_v21 = vadd.f32 %v4082_v20, %v4503_v1 }
 0x6c7   :  { %v1645_v22 = vpop.f32.mrf.mxu0 }
 0x6c8   :  { %v4733_v23 = vadd.f32 %v1645_v22, %v4498_v0  ;;  %v1661_v24 = vsel %vm55_vm0, %v4730_v21, 0.0 }
 0x6c9   :  { %1662 = vadd.xlane.f32.xlu1 %v1661_v24 }
 0x6ca   :  { %v1658_v25 = vsel %vm55_vm0, %v4733_v23, 0.0 }
 0x6cb   :  { %1659 = vadd.xlane.f32.xlu0 %v1658_v25 }
 0x6cd   :  { %v4815_v10 = vpop.f32.mrf.mxu0 }
 0x6cf   :  { %v4821_v46 = vpop.f32.mrf.mxu0 }
 0x6da   :  { %2060 = vrot.lane.b32.xlu1 %v4821_v46, %s4401_s19 }
 0x752   :  { %v1663_v26 = vpop.xlane.xlu1 %1662 }
 0x753   :  { %v1665_v27 = vmul.f32 0.03125, %v1663_v26 }
 0x754   :  { %v1660_v28 = vpop.xlane.xlu0 %1659 }
 0x755   :  { %v1664_v29 = vmul.f32 0.03125, %v1660_v28  ;;  %v4740_v30 = vsub.f32 %v4730_v21, %v1665_v27 }
 0x756   :  { %v2061_v14 = vpop.permute.xlu1 %2060 }
 0x757   :  { %v4743_v1 = vsub.f32 %v4733_v23, %v1664_v29  ;;  %v1669_v31 = vmul.f32 %v4740_v30, %v4740_v30  ;;  %v1701_v5 = vmul.f32 %v3788_v62, %v4740_v30 }
 0x759   :  { %v1668_v0 = vmul.f32 %v4743_v1, %v4743_v1  ;;  %v1673_v32 = vsel %vm55_vm0, %v1669_v31, 0.0  ;;  %v1700_v63 = vmul.f32 %v3788_v62, %v4743_v1 }
 0x75b   :  { %v1670_v45 = vsel %vm55_vm0, %v1668_v0, 0.0 }
 0x75c   :  { %1671 = vadd.xlane.f32.xlu0 %v1670_v45 }
 0x760   :  { %1674 = vadd.xlane.f32.xlu0 %v1673_v32 }
 0x776   :  { %2062 = vrot.lane.b32.xlu0 %v4815_v10, %s4401_s19 }
 0x7e5   :  { %v1672_v43 = vpop.xlane.xlu0 %1671 }
 0x7e6   :  { %v1676_v47 = vmul.f32 0.032258064, %v1672_v43 }
 0x7e8   :  { %4327 = vrsqrt.f32 %v1676_v47  ;;  %vm1680_vm10 = vcmp.eq.f32.partialorder %v1676_v47, inf  ;;  %v1683_v52 = vand.u32 2147483648, %v1676_v47  ;;  %vm1682_vm11 = vcmp.eq.f32.partialorder %v1676_v47, 0.0 }
 0x7e9   :  { %v1675_v48 = vpop.xlane.xlu0 %1674 }
 0x7ea   :  { %v1677_v49 = vmul.f32 0.032258064, %v1675_v48 }
 0x7ec   :  { %4329 = vrsqrt.f32 %v1677_v49  ;;  %vm1687_vm12 = vcmp.eq.f32.partialorder %v1677_v49, inf  ;;  %v1690_v58 = vand.u32 2147483648, %v1677_v49  ;;  %vm1689_vm13 = vcmp.eq.f32.partialorder %v1677_v49, 0.0 }
 0x7ed   :  { %v2063_v12 = vpop.permute.xlu0 %2062 }
 0x7f5   :  { %v4328_v50 = vpop.eup %4327 }
 0x7f6   :  { %v1679_v51 = vmul.f32 %v4328_v50, %v1676_v47 }
 0x7f8   :  { %v1681_v53 = vsel %vm1680_vm10, %v1676_v47, %v1679_v51 }
 0x7f9   :  { %v4330_v54 = vpop.eup %4329  ;;  %v1684_v55 = vsel %vm1682_vm11, %v1683_v52, %v1681_v53 }
 0x7fa   :  { %v1692_v56 = vadd.f32 1e-06, %v1684_v55  ;;  %v1686_v57 = vmul.f32 %v4330_v54, %v1677_v49 }
 0x7fc   :  { %4331 = vrcp.f32 %v1692_v56  ;;  %v1688_v59 = vsel %vm1687_vm12, %v1677_v49, %v1686_v57 }
 0x7fd   :  { %v1691_v60 = vsel %vm1689_vm13, %v1690_v58, %v1688_v59 }
 0x7fe   :  { %v1693_v61 = vadd.f32 1e-06, %v1691_v60 }
 0x800   :  { %4333 = vrcp.f32 %v1693_v61 }
 0x809   :  { %v4332_v2 = vpop.eup %4331 }
 0x80a   :  { %v1702_v4 = vmul.f32 %v4332_v2, %v1700_v63 }
 0x80c   :  { %v1708_v6 = vadd.f32 %v3789_v3, %v1702_v4 }
 0x80d   :  { %v4334_v7 = vpop.eup %4333 }
 0x80e   :  { %v1703_v8 = vmul.f32 %v4334_v7, %v1701_v5  ;;  %4091 = vmatprep.mubr.msk.f32.mxu1 %vm55_vm0, %v1708_v6 }
 0x810   :  { %v1709_v9 = vadd.f32 %v3789_v3, %v1703_v8 }
 0x812   :  { %4092 = vmatmul.mubr.msk.f32.vlgmr.msra.gmra.mxu1 %vm55_vm0, %v1709_v9 }
 0x813   :  { %4109 = vmatprep.mubr.msk.f32.mxu1 %vm4398_vm5, %v4397_v44  ;;  %4106 = vmatpush3.xpose.msk.msra.mxu1 %vm198_vm6, %v4815_v10 }
 0x814   :  { %4107 = vmatprep.subr.mxu1 %v4397_v44 }
 0x817   :  { %4108 = vmatpush3.xpose.msk.msra.mxu1 %vm198_vm6, %v4821_v46 }
 0x818   :  { %4119 = vmatprep.subr.mxu1 %v4397_v44 }
 0x8d2   :  { %v4829_v11 = vpop.f32.mrf.mxu1 }
 0x8d4   :  { %v4831_v13 = vpop.f32.mrf.mxu1 }
 0x8d5   :  { %2058 = vrot.lane.b32.xlu1 %v4831_v13, %s4401_s19  ;;  %4110 = vmatmul.mubr.msk.f32.vlgmr.msra.gmra.mxu1 %vm198_vm6, %v4831_v13 }
 0x8d6   :  { %4120 = vmatpush3.xpose.msk.msra.mxu1 %vm198_vm6, %v2063_v12  ;;  %4123 = vmatprep.mubr.msk.f32.mxu1 %vm4398_vm5, %v4397_v44 }
 0x8d7   :  { %4121 = vmatprep.subr.mxu1 %v4397_v44 }
 0x8da   :  { %4122 = vmatpush3.xpose.msk.msra.mxu1 %vm198_vm6, %v2061_v14 }
 0x8db   :  { %4140 = vmatprep.subr.mxu1 %v4397_v44 }
 0x947   :  { %v2059_v15 = vpop.permute.xlu1 %2058 }
 0x948   :  { %4124 = vmatmul.mubr.msk.f32.vlgmr.msra.gmra.mxu1 %vm198_vm6, %v2059_v15 }
 0x949   :  { %4144 = vmatprep.mubr.msk.f32.mxu1 %vm4398_vm5, %v4397_v44 }
 0x995   :  { %v1958_v16 = vpop.f32.mrf.mxu1 }
 0x996   :  { %v1962_v18 = vmul.f32 0.35355338, %v1958_v16 }
 0x997   :  { %v4111_v19 = vpop.f32.mrf.mxu1 }
 0x998   :  { %v1963_v20 = vadd.f32 %v1962_v18, %v4849_v17 }
 0x99a   :  { %v1965_v22 = vsel %vm1964_vm14, %v1963_v20, -inf }
 0x99b   :  { %1966 = vmax.xlane.f32.xlu1 %v1965_v22 }
 0x9ac   :  { %1978 = vrot.lane.b32.xlu1 %v4815_v10, %s4400_s18 }
 0x9b0   :  { %2155 = vrot.lane.b32.xlu1 %v4815_v10, %s4399_s17 }
 0x9b4   :  { %2153 = vrot.lane.b32.xlu1 %v4821_v46, %s4399_s17 }
 0x9b8   :  { %2242 = vrot.lane.b32.xlu1 %v4815_v10, %s4402_s20 }
 0x9bc   :  { %2238 = vrot.lane.b32.xlu1 %v4831_v13, %s4402_s20 }
 0x9c0   :  { %2333 = vrot.lane.b32.xlu1 %v4821_v46, %s4403_s21 }
 0xa08   :  { %v2136_v24 = vpop.f32.mrf.mxu1 }
 0xa09   :  { %v2140_v25 = vmul.f32 0.35355338, %v2136_v24 }
 0xa0a   :  { %v4125_v26 = vpop.f32.mrf.mxu1 }
 0xa0b   :  { %v2141_v27 = vadd.f32 %v2140_v25, %v4849_v17 }
 0xa0d   :  { %v2142_v28 = vsel %vm1964_vm14, %v2141_v27, -inf }
 0xa0e   :  { %2143 = vmax.xlane.f32.xlu0 %v2142_v28 }
 0xa24   :  { %v1967_v29 = vpop.xlane.xlu1 %1966 }
 0xa25   :  { %v1968_v30 = vsub.f32 %v1963_v20, %v1967_v29 }
 0xa27   :  { %v1969_v1 = vmul.f32 1.442695, %v1968_v30 }
 0xa28   :  { %v1979_v0 = vpop.permute.xlu1 %1978 }
 0xa29   :  { %4335 = vpow2.f32 %v1969_v1  ;;  %4113 = vmatpush3.msk.msra.mxu0 %vm1984_vm15, %v1979_v0 }
 0xa2a   :  { %4114 = vmatprep.subr.mxu0 %v4397_v44 }
 0xa2c   :  { %v2156_v47 = vpop.permute.xlu1 %2155 }
 0xa30   :  { %v2154_v50 = vpop.permute.xlu1 %2153 }
 0xa34   :  { %v2243_v53 = vpop.permute.xlu1 %2242 }
 0xa36   :  { %v4336_v45 = vpop.eup %4335 }
 0xa37   :  { %v1971_v31 = vsel %vm1964_vm14, %v4336_v45, 0.0 }
 0xa38   :  { %1972 = vadd.xlane.f32.xlu0 %v1971_v31  ;;  %v2239_v55 = vpop.permute.xlu1 %2238 }
 0xa3c   :  { %v2334_v7 = vpop.permute.xlu1 %2333 }
 0xa97   :  { %v2144_v32 = vpop.xlane.xlu0 %2143 }
 0xa98   :  { %v2145_v35 = vsub.f32 %v2141_v27, %v2144_v32 }
 0xa9a   :  { %v2146_v36 = vmul.f32 1.442695, %v2145_v35  ;;  %v3814_v35 = vld [vmem:[%s5159_s1 + $0x10] sm:$0xff] }
 0xa9c   :  { %4337 = vpow2.f32 %v2146_v36 }
 0xaa9   :  { %v4338_v38 = vpop.eup %4337 }
 0xaaa   :  { %v2148_v40 = vsel %vm1964_vm14, %v4338_v38, 0.0 }
 0xaab   :  { %2149 = vadd.xlane.f32.xlu0 %v2148_v40 }
 0xac1   :  { %1976 = vrot.lane.b32.xlu0 %v4821_v46, %s4400_s18  ;;  %v1973_v41 = vpop.xlane.xlu0 %1972 }
 0xac2   :  { %4339 = vrcp.f32 %v1973_v41 }
 0xac5   :  { %2240 = vrot.lane.b32.xlu0 %v4821_v46, %s4402_s20 }
 0xacf   :  { %v4340_v43 = vpop.eup %4339 }
 0xad0   :  { %v1975_v49 = vmul.f32 %v4340_v43, %v4336_v45 }
 0xb34   :  { %v2150_v42 = vpop.xlane.xlu0 %2149 }
 0xb35   :  { %4341 = vrcp.f32 %v2150_v42  ;;  %v4982_v42 = vld [vmem:[%s5161_s3 + $0x8] sm:$0xff] }
 0xb38   :  { %v1977_v48 = vpop.permute.xlu0 %1976 }
 0xb39   :  { %4115 = vmatpush3.msra.mxu0 %v1977_v48 }
 0xb3a   :  { %4117 = vmatmul.mubr.msk.f32.vlgmr.msra.gmra.mxu0 %vm1964_vm14, %v1975_v49  ;;  %4126 = vmatprep.subr.mxu0 %v4397_v44 }
 0xb3b   :  { %4127 = vmatpush3.msk.msra.mxu0 %vm1984_vm15, %v2156_v47  ;;  %4130 = vmatprep.mubr.msk.f32.mxu0 %vm4398_vm5, %v4397_v44 }
 0xb3c   :  { %4128 = vmatprep.subr.mxu0 %v4397_v44  ;;  %v2241_v54 = vpop.permute.xlu0 %2240 }
 0xb3d   :  { %4129 = vmatpush3.msra.mxu0 %v2154_v50 }
 0xb3e   :  { %4133 = vmatprep.subr.mxu0 %v4397_v44 }
 0xb42   :  { %v4342_v51 = vpop.eup %4341 }
 0xb43   :  { %v2152_v52 = vmul.f32 %v4342_v51, %v4338_v38 }
 0xb45   :  { %4131 = vmatmul.mubr.msk.f32.vlgmr.msra.gmra.mxu0 %vm1964_vm14, %v2152_v52 }
 0xb46   :  { %4134 = vmatpush3.xpose.msk.msra.mxu0 %vm198_vm6, %v2243_v53  ;;  %4137 = vmatprep.mubr.msk.f32.mxu0 %vm4398_vm5, %v4397_v44 }
 0xb47   :  { %4135 = vmatprep.subr.mxu0 %v4397_v44 }
 0xb4a   :  { %4136 = vmatpush3.xpose.msk.msra.mxu0 %vm198_vm6, %v2241_v54 }
 0xb4b   :  { %4154 = vmatprep.subr.mxu0 %v4397_v44 }
 0xb4d   :  { %4138 = vmatmul.mubr.msk.f32.vlgmr.msra.gmra.mxu0 %vm198_vm6, %v2239_v55 }
 0xb4e   :  { %4158 = vmatprep.mubr.msk.f32.mxu0 %vm4398_vm5, %v4397_v44 }
 0xbfa   :  { %v2053_v56 = vpop.f32.mrf.mxu0 }
 0xbfb   :  { %2057 = vst.msk [vmem:[#allocation2] sm:$0xff] %vm198_vm6, %v2053_v56 }
 0xbfc   :  { %v4118_v57 = vpop.f32.mrf.mxu0 }
 0xc05   :  { %v4893_v58 = vpop.f32.mrf.mxu0 }
 0xc07   :  { %v4132_v59 = vpop.f32.mrf.mxu0 }
 0xc0d   :  { %v2316_v60 = vpop.f32.mrf.mxu0 }
 0xc0e   :  { %v2320_v61 = vmul.f32 0.35355338, %v2316_v60 }
 0xc0f   :  { %v4139_v62 = vpop.f32.mrf.mxu0 }
 0xc10   :  { %v2321_v63 = vadd.f32 %v2320_v61, %v4849_v17 }
 0xc12   :  { %v2322_v2 = vsel %vm1964_vm14, %v2321_v63, -inf }
 0xc13   :  { %2323 = vmax.xlane.f32.xlu0 %v2322_v2 }
 0xc29   :  { %2335 = vrot.lane.b32.xlu0 %v4815_v10, %s4403_s21 }
 0xc2d   :  { %2422 = vrot.lane.b32.xlu0 %v4815_v10, %s4404_s0 }
 0xc31   :  { %2418 = vrot.lane.b32.xlu0 %v4831_v13, %s4404_s0 }
 0xc9c   :  { %v2324_v3 = vpop.xlane.xlu0 %2323 }
 0xc9d   :  { %v2325_v4 = vsub.f32 %v2321_v63, %v2324_v3 }
 0xc9f   :  { %v2326_v5 = vmul.f32 1.442695, %v2325_v4 }
 0xca0   :  { %v2336_v6 = vpop.permute.xlu0 %2335 }
 0xca1   :  { %4343 = vpow2.f32 %v2326_v5  ;;  %4141 = vmatpush3.msk.msra.mxu1 %vm1984_vm15, %v2336_v6 }
 0xca2   :  { %4142 = vmatprep.subr.mxu1 %v4397_v44 }
 0xca3   :  { %4143 = vmatpush3.msra.mxu1 %v2334_v7 }
 0xca4   :  { %4147 = vmatprep.subr.mxu1 %v4397_v44  ;;  %v2423_v15 = vpop.permute.xlu0 %2422 }
 0xca8   :  { %v2419_v18 = vpop.permute.xlu0 %2418 }
 0xcae   :  { %v4344_v8 = vpop.eup %4343 }
 0xcaf   :  { %v2328_v9 = vsel %vm1964_vm14, %v4344_v8, 0.0 }
 0xcb0   :  { %2329 = vadd.xlane.f32.xlu1 %v2328_v9 }
 0xcc1   :  { %2420 = vrot.lane.b32.xlu1 %v4821_v46, %s4404_s0 }
 0xd39   :  { %v2330_v12 = vpop.xlane.xlu1 %2329 }
 0xd3a   :  { %4345 = vrcp.f32 %v2330_v12 }
 0xd3d   :  { %v2421_v16 = vpop.permute.xlu1 %2420 }
 0xd47   :  { %v4346_v13 = vpop.eup %4345 }
 0xd48   :  { %v2332_v14 = vmul.f32 %v4346_v13, %v4344_v8 }
 0xd4a   :  { %4145 = vmatmul.mubr.msk.f32.vlgmr.msra.gmra.mxu1 %vm1964_vm14, %v2332_v14 }
 0xd4b   :  { %4148 = vmatpush3.xpose.msk.msra.mxu1 %vm198_vm6, %v2423_v15  ;;  %4151 = vmatprep.mubr.msk.f32.mxu1 %vm4398_vm5, %v4397_v44 }
 0xd4c   :  { %4149 = vmatprep.subr.mxu1 %v4397_v44 }
 0xd4f   :  { %4150 = vmatpush3.xpose.msk.msra.mxu1 %vm198_vm6, %v2421_v16 }
 0xd50   :  { %4172 = vmatprep.subr.mxu1 %v4397_v44 }
 0xd52   :  { %4152 = vmatmul.mubr.msk.f32.vlgmr.msra.gmra.mxu1 %vm198_vm6, %v2419_v18 }
 0xd53   :  { %4176 = vmatprep.mubr.msk.f32.mxu1 %vm4398_vm5, %v4397_v44 }
 0xe0a   :  { %v4919_v19 = vpop.f32.mrf.mxu1 }
 0xe0c   :  { %v4146_v20 = vpop.f32.mrf.mxu1 }
 0xe12   :  { %v2496_v22 = vpop.f32.mrf.mxu1 }
 0xe13   :  { %v2500_v24 = vmul.f32 0.35355338, %v2496_v22 }
 0xe14   :  { %v4153_v25 = vpop.f32.mrf.mxu1 }
 0xe15   :  { %v2501_v26 = vadd.f32 %v2500_v24, %v4849_v17 }
 0xe17   :  { %v2502_v27 = vsel %vm1964_vm14, %v2501_v26, -inf }
 0xe18   :  { %2503 = vmax.xlane.f32.xlu1 %v2502_v27 }
 0xe29   :  { %2513 = vrot.lane.b32.xlu1 %v4821_v46, %s4405_s22 }
 0xea1   :  { %v2504_v28 = vpop.xlane.xlu1 %2503 }
 0xea2   :  { %v2505_v29 = vsub.f32 %v2501_v26, %v2504_v28 }
 0xea4   :  { %v2506_v30 = vmul.f32 1.442695, %v2505_v29 }
 0xea5   :  { %v2514_v31 = vpop.permute.xlu1 %2513 }
 0xea6   :  { %4347 = vpow2.f32 %v2506_v30 }
 0xeb3   :  { %v4348_v1 = vpop.eup %4347 }
 0xeb4   :  { %v2508_v0 = vsel %vm1964_vm14, %v4348_v1, 0.0 }
 0xeb5   :  { %2509 = vadd.xlane.f32.xlu0 %v2508_v0 }
 0xecb   :  { %2515 = vrot.lane.b32.xlu0 %v4815_v10, %s4405_s22  ;;  %v3815_v10 = vld [vmem:[%s5159_s1 + $0x18] sm:$0x3] }
 0xf3e   :  { %v2510_v45 = vpop.xlane.xlu0 %2509 }
 0xf3f   :  { %4349 = vrcp.f32 %v2510_v45 }
 0xf42   :  { %v2516_v17 = vpop.permute.xlu0 %2515 }
 0xf43   :  { %4155 = vmatpush3.msk.msra.mxu0 %vm1984_vm15, %v2516_v17 }
 0xf44   :  { %4156 = vmatprep.subr.mxu0 %v4397_v44 }
 0xf45   :  { %4157 = vmatpush3.msra.mxu0 %v2514_v31 }
 0xf46   :  { %4161 = vmatprep.subr.mxu0 %v4754_v33 }
 0xf4c   :  { %v4350_v46 = vpop.eup %4349 }
 0xf4d   :  { %v2512_v32 = vmul.f32 %v4350_v46, %v4348_v1 }
 0xf4f   :  { %4159 = vmatmul.mubr.msk.f32.vlgmr.msra.gmra.mxu0 %vm1964_vm14, %v2512_v32 }
 0xf50   :  { %4162 = vmatpush3.msra.mxu0 %v4754_v33  ;;  %4169 = vmatprep.mubr.msk.f32.mxu0 %vm55_vm0, %v3814_v35 }
 0xf51   :  { %4163 = vmatprep.subr.mxu0 %v4759_v34 }
 0xf52   :  { %4164 = vmatpush3.msra.mxu0 %v4759_v34 }
 0xf53   :  { %4165 = vmatprep.subr.mxu0 %v4772_v37 }
 0xf54   :  { %4166 = vmatpush3.msra.mxu0 %v4772_v37 }
 0xf55   :  { %4167 = vmatprep.subr.mxu0 %v4783_v39 }
 0xf56   :  { %4168 = vmatpush3.msra.mxu0 %v4783_v39 }
 0xf57   :  { %4170 = vmatmul.mubr.msk.f32.vlgmr.msra.gmra.mxu0 %vm55_vm0, %v3815_v10  ;;  %4179 = vmatprep.subr.mxu0 %v4397_v44 }
 0xf58   :  { %4183 = vmatprep.mubr.msk.f32.mxu0 %vm4398_vm5, %v4397_v44 }
0x100f   :  { %v4950_v33 = vpop.f32.mrf.mxu0 }
0x1011   :  { %v4160_v34 = vpop.f32.mrf.mxu0 }
0x1017   :  { %v4952_v36 = vpop.f32.mrf.mxu0 }
0x1018   :  { %2865 = vrot.lane.b32.xlu1 %v4952_v36, %s4401_s19  ;;  %4173 = vmatpush3.xpose.msk.msra.mxu1 %vm198_vm6, %v4952_v36 }
0x1019   :  { %v4958_v37 = vpop.f32.mrf.mxu0  ;;  %4174 = vmatprep.subr.mxu1 %v4397_v44 }
0x101a   :  { %2863 = vrot.lane.b32.xlu0 %v4958_v37, %s4401_s19 }
0x101c   :  { %2861 = vrot.lane.b32.xlu1 %v4829_v11, %s4401_s19  ;;  %4175 = vmatpush3.xpose.msk.msra.mxu1 %vm198_vm6, %v4958_v37 }
0x101d   :  { %4186 = vmatprep.subr.mxu1 %v4397_v44 }
0x101f   :  { %4177 = vmatmul.mubr.msk.f32.vlgmr.msra.gmra.mxu1 %vm198_vm6, %v4829_v11 }
0x1020   :  { %4190 = vmatprep.mubr.msk.f32.mxu1 %vm4398_vm5, %v4397_v44 }
0x108a   :  { %v2866_v39 = vpop.permute.xlu1 %2865 }
0x108b   :  { %4187 = vmatpush3.xpose.msk.msra.mxu1 %vm198_vm6, %v2866_v39 }
0x108c   :  { %4188 = vmatprep.subr.mxu1 %v4397_v44  ;;  %v2864_v38 = vpop.permute.xlu0 %2863 }
0x108e   :  { %v2862_v40 = vpop.permute.xlu1 %2861 }
0x108f   :  { %4189 = vmatpush3.xpose.msk.msra.mxu1 %vm198_vm6, %v2864_v38 }
0x1090   :  { %4207 = vmatprep.subr.mxu1 %v4397_v44 }
0x1092   :  { %4191 = vmatmul.mubr.msk.f32.vlgmr.msra.gmra.mxu1 %vm198_vm6, %v2862_v40 }
0x1093   :  { %4211 = vmatprep.mubr.msk.f32.mxu1 %vm4398_vm5, %v4397_v44 }
0x10df   :  { %v2763_v41 = vpop.f32.mrf.mxu1 }
0x10e0   :  { %v2767_v43 = vmul.f32 0.35355338, %v2763_v41 }
0x10e1   :  { %v4178_v47 = vpop.f32.mrf.mxu1 }
0x10e2   :  { %v2768_v48 = vadd.f32 %v4982_v42, %v2767_v43 }
0x10e4   :  { %v2769_v49 = vsel %vm1964_vm14, %v2768_v48, -inf }
0x10e5   :  { %2770 = vmax.xlane.f32.xlu0 %v2769_v49 }
0x10fb   :  { %2782 = vrot.lane.b32.xlu0 %v4952_v36, %s4400_s18 }
0x1152   :  { %v2939_v50 = vpop.f32.mrf.mxu1 }
0x1153   :  { %v2943_v51 = vmul.f32 0.35355338, %v2939_v50 }
0x1154   :  { %v4192_v52 = vpop.f32.mrf.mxu1 }
0x1155   :  { %v2944_v53 = vadd.f32 %v4982_v42, %v2943_v51 }
0x1157   :  { %v2945_v54 = vsel %vm1964_vm14, %v2944_v53, -inf }
0x1158   :  { %2946 = vmax.xlane.f32.xlu1 %v2945_v54 }
0x1169   :  { %2780 = vrot.lane.b32.xlu1 %v4958_v37, %s4400_s18 }
0x116d   :  { %2958 = vrot.lane.b32.xlu1 %v4952_v36, %s4399_s17 }
0x116e   :  { %v2771_v55 = vpop.xlane.xlu0 %2770 }
0x116f   :  { %v2772_v56 = vsub.f32 %v2768_v48, %v2771_v55 }
0x1171   :  { %v2773_v57 = vmul.f32 1.442695, %v2772_v56  ;;  %2956 = vrot.lane.b32.xlu1 %v4958_v37, %s4399_s17 }
0x1172   :  { %v2783_v59 = vpop.permute.xlu0 %2782 }
0x1173   :  { %4351 = vpow2.f32 %v2773_v57  ;;  %4180 = vmatpush3.msk.msra.mxu0 %vm1984_vm15, %v2783_v59 }
0x1174   :  { %4181 = vmatprep.subr.mxu0 %v4397_v44 }
0x1175   :  { %3043 = vrot.lane.b32.xlu1 %v4958_v37, %s4402_s20 }
0x1180   :  { %v4352_v60 = vpop.eup %4351 }
0x1181   :  { %v2775_v61 = vsel %vm1964_vm14, %v4352_v60, 0.0 }
0x1182   :  { %2776 = vadd.xlane.f32.xlu0 %v2775_v61 }
0x11e1   :  { %v2947_v62 = vpop.xlane.xlu1 %2946 }
0x11e2   :  { %v2948_v63 = vsub.f32 %v2944_v53, %v2947_v62 }
0x11e4   :  { %v2949_v2 = vmul.f32 1.442695, %v2948_v63 }
0x11e5   :  { %v2781_v3 = vpop.permute.xlu1 %2780 }
0x11e6   :  { %4353 = vpow2.f32 %v2949_v2  ;;  %4182 = vmatpush3.msra.mxu0 %v2781_v3  ;;  %v3404_v2 = vld [vmem:[%s5166_s8 + $0x8] sm:$0xff]  ;;  %v3403_v3 = vld [vmem:[%s5166_s8] sm:$0xff] }
0x11e7   :  { %4193 = vmatprep.subr.mxu0 %v4397_v44 }
0x11e9   :  { %v2959_v7 = vpop.permute.xlu1 %2958 }
0x11ed   :  { %v2957_v12 = vpop.permute.xlu1 %2956 }
0x11f1   :  { %v3044_v18 = vpop.permute.xlu1 %3043 }
0x11f3   :  { %v4354_v4 = vpop.eup %4353 }
0x11f4   :  { %v2951_v5 = vsel %vm1964_vm14, %v4354_v4, 0.0 }
0x11f5   :  { %2952 = vadd.xlane.f32.xlu0 %v2951_v5 }
0x120b   :  { %v2777_v6 = vpop.xlane.xlu0 %2776  ;;  %3045 = vrot.lane.b32.xlu0 %v4952_v36, %s4402_s20 }
0x120c   :  { %4355 = vrcp.f32 %v2777_v6 }
0x120f   :  { %3041 = vrot.lane.b32.xlu0 %v4829_v11, %s4402_s20 }
0x1219   :  { %v4356_v8 = vpop.eup %4355 }
0x121a   :  { %v2779_v9 = vmul.f32 %v4356_v8, %v4352_v60 }
0x121c   :  { %4184 = vmatmul.mubr.msk.f32.vlgmr.msra.gmra.mxu0 %vm1964_vm14, %v2779_v9 }
0x121d   :  { %4194 = vmatpush3.msk.msra.mxu0 %vm1984_vm15, %v2959_v7  ;;  %4197 = vmatprep.mubr.msk.f32.mxu0 %vm4398_vm5, %v4397_v44 }
0x121e   :  { %4195 = vmatprep.subr.mxu0 %v4397_v44 }
0x121f   :  { %4196 = vmatpush3.msra.mxu0 %v2957_v12 }
0x1220   :  { %4200 = vmatprep.subr.mxu0 %v4397_v44 }
0x127e   :  { %v2953_v13 = vpop.xlane.xlu0 %2952 }
0x127f   :  { %4357 = vrcp.f32 %v2953_v13 }
0x1282   :  { %v3046_v16 = vpop.permute.xlu0 %3045 }
0x1286   :  { %v3042_v20 = vpop.permute.xlu0 %3041 }
0x128c   :  { %v4358_v14 = vpop.eup %4357 }
0x128d   :  { %v2955_v15 = vmul.f32 %v4358_v14, %v4354_v4 }
0x128f   :  { %4198 = vmatmul.mubr.msk.f32.vlgmr.msra.gmra.mxu0 %vm1964_vm14, %v2955_v15 }
0x1290   :  { %4201 = vmatpush3.xpose.msk.msra.mxu0 %vm198_vm6, %v3046_v16  ;;  %4204 = vmatprep.mubr.msk.f32.mxu0 %vm4398_vm5, %v4397_v44 }
0x1291   :  { %4202 = vmatprep.subr.mxu0 %v4397_v44 }
0x1294   :  { %4203 = vmatpush3.xpose.msk.msra.mxu0 %vm198_vm6, %v3044_v18 }
0x1295   :  { %4221 = vmatprep.subr.mxu0 %v4397_v44 }
0x1297   :  { %4205 = vmatmul.mubr.msk.f32.vlgmr.msra.gmra.mxu0 %vm198_vm6, %v3042_v20 }
0x1298   :  { %4225 = vmatprep.mubr.msk.f32.mxu0 %vm4398_vm5, %v4397_v44 }
0x12dc   :  { %v2856_v22 = vpop.f32.mrf.mxu0 }
0x12dd   :  { %2860 = vst.msk [vmem:[#allocation2 + $0x8] sm:$0xff] %vm198_vm6, %v2856_v22 }
0x12de   :  { %v4185_v24 = vpop.f32.mrf.mxu0 }
0x134f   :  { %v3032_v25 = vpop.f32.mrf.mxu0 }
0x1351   :  { %v4199_v26 = vpop.f32.mrf.mxu0 }
0x1357   :  { %v3119_v27 = vpop.f32.mrf.mxu0 }
0x1358   :  { %v3123_v28 = vmul.f32 0.35355338, %v3119_v27 }
0x1359   :  { %v4206_v29 = vpop.f32.mrf.mxu0 }
0x135a   :  { %v3124_v30 = vadd.f32 %v4982_v42, %v3123_v28  ;;  %v3547_v28 = vld [vmem:[%s5167_s9 + $0x18] sm:$0xff]  ;;  %v3546_v29 = vld [vmem:[%s5167_s9 + $0x10] sm:$0xff] }
0x135c   :  { %v3125_v1 = vsel %vm1964_vm14, %v3124_v30, -inf }
0x135d   :  { %3126 = vmax.xlane.f32.xlu1 %v3125_v1  ;;  %v3544_v1 = vld [vmem:[%s5167_s9] sm:$0xff] }
0x136e   :  { %3136 = vrot.lane.b32.xlu1 %v4958_v37, %s4403_s21 }
0x1372   :  { %3225 = vrot.lane.b32.xlu1 %v4952_v36, %s4404_s0 }
0x1376   :  { %3221 = vrot.lane.b32.xlu1 %v4829_v11, %s4404_s0 }
0x13e6   :  { %v3127_v0 = vpop.xlane.xlu1 %3126 }
0x13e7   :  { %v3128_v45 = vsub.f32 %v3124_v30, %v3127_v0  ;;  %v3545_v30 = vld [vmem:[%s5167_s9 + $0x8] sm:$0xff]  ;;  %v3645_v0 = vld [vmem:[%s5169_s11 + $0x38] sm:$0xff] }
0x13e9   :  { %v3129_v17 = vmul.f32 1.442695, %v3128_v45  ;;  %v3644_v45 = vld [vmem:[%s5169_s11 + $0x30] sm:$0xff] }
0x13ea   :  { %v3137_v11 = vpop.permute.xlu1 %3136 }
0x13eb   :  { %4359 = vpow2.f32 %v3129_v17  ;;  %v3643_v17 = vld [vmem:[%s5169_s11 + $0x28] sm:$0xff] }
0x13ee   :  { %v3226_v39 = vpop.permute.xlu1 %3225 }
0x13f2   :  { %v3222_v40 = vpop.permute.xlu1 %3221 }
0x13f8   :  { %v4360_v31 = vpop.eup %4359 }
0x13f9   :  { %v3131_v46 = vsel %vm1964_vm14, %v4360_v31, 0.0 }
0x13fa   :  { %3132 = vadd.xlane.f32.xlu0 %v3131_v46 }
0x1410   :  { %3138 = vrot.lane.b32.xlu0 %v4952_v36, %s4403_s21 }
0x1414   :  { %3223 = vrot.lane.b32.xlu0 %v4958_v37, %s4404_s0 }
0x1483   :  { %v3133_v32 = vpop.xlane.xlu0 %3132 }
0x1484   :  { %4361 = vrcp.f32 %v3133_v32 }
0x1487   :  { %v3139_v35 = vpop.permute.xlu0 %3138 }
0x1488   :  { %4208 = vmatpush3.msk.msra.mxu1 %vm1984_vm15, %v3139_v35 }
0x1489   :  { %4209 = vmatprep.subr.mxu1 %v4397_v44 }
0x148a   :  { %4210 = vmatpush3.msra.mxu1 %v3137_v11 }
0x148b   :  { %4214 = vmatprep.subr.mxu1 %v4397_v44  ;;  %v3224_v38 = vpop.permute.xlu0 %3223 }
0x1491   :  { %v4362_v10 = vpop.eup %4361 }
0x1492   :  { %v3135_v34 = vmul.f32 %v4362_v10, %v4360_v31  ;;  %v3642_v31 = vld [vmem:[%s5169_s11 + $0x20] sm:$0xff] }
0x1494   :  { %4212 = vmatmul.mubr.msk.f32.vlgmr.msra.gmra.mxu1 %vm1964_vm14, %v3135_v34 }
0x1495   :  { %4215 = vmatpush3.xpose.msk.msra.mxu1 %vm198_vm6, %v3226_v39  ;;  %4218 = vmatprep.mubr.msk.f32.mxu1 %vm4398_vm5, %v4397_v44  ;;  %vm3646_vm5 = vcmask 523264  }
0x1496   :  { %4216 = vmatprep.subr.mxu1 %v4397_v44 }
0x1499   :  { %4217 = vmatpush3.xpose.msk.msra.mxu1 %vm198_vm6, %v3224_v38 }
0x149a   :  { %4239 = vmatprep.subr.mxu1 %v3547_v28 }
0x149c   :  { %4219 = vmatmul.mubr.msk.f32.vlgmr.msra.gmra.mxu1 %vm198_vm6, %v3222_v40 }
0x149d   :  { %4240 = vmatpush3.msra.mxu1 %v3547_v28 }
0x149e   :  { %4241 = vmatprep.subr.mxu1 %v3546_v29 }
0x149f   :  { %4242 = vmatpush3.msra.mxu1 %v3546_v29 }
0x14a0   :  { %4243 = vmatprep.subr.mxu1 %v3545_v30 }
0x14a1   :  { %4244 = vmatpush3.msra.mxu1 %v3545_v30 }
0x14a2   :  { %4245 = vmatprep.subr.mxu1 %v3544_v1 }
0x14a3   :  { %4246 = vmatpush3.msra.mxu1 %v3544_v1 }
0x1554   :  { %v3212_v41 = vpop.f32.mrf.mxu1 }
0x1556   :  { %v4213_v43 = vpop.f32.mrf.mxu1 }
0x155c   :  { %v3299_v47 = vpop.f32.mrf.mxu1 }
0x155d   :  { %v3303_v48 = vmul.f32 0.35355338, %v3299_v47 }
0x155e   :  { %v4220_v49 = vpop.f32.mrf.mxu1 }
0x155f   :  { %v3304_v50 = vadd.f32 %v4982_v42, %v3303_v48 }
0x1561   :  { %v3305_v51 = vsel %vm1964_vm14, %v3304_v50, -inf }
0x1562   :  { %3306 = vmax.xlane.f32.xlu0 %v3305_v51 }
0x1578   :  { %3318 = vrot.lane.b32.xlu0 %v4952_v36, %s4405_s22 }
0x157c   :  { %2234 = vrot.lane.b32.xlu0 %v4893_v58, %s4410_s29 }
0x1580   :  { %3037 = vrot.lane.b32.xlu0 %v3032_v25, %s4410_s29 }
0x1584   :  { %3217 = vrot.lane.b32.xlu0 %v3212_v41, %s4411_s30 }
0x15eb   :  { %v3307_v52 = vpop.xlane.xlu0 %3306 }
0x15ec   :  { %v3308_v53 = vsub.f32 %v3304_v50, %v3307_v52  ;;  %v3841_v52 = vld [vmem:[%s5171_s13 + $0x2] ss:$0 sm:$0xff] }
0x15ee   :  { %v3309_v54 = vmul.f32 1.442695, %v3308_v53 }
0x15ef   :  { %v3319_v55 = vpop.permute.xlu0 %3318 }
0x15f0   :  { %4363 = vpow2.f32 %v3309_v54  ;;  %4222 = vmatpush3.msk.msra.mxu0 %vm1984_vm15, %v3319_v55  ;;  %v3842_v55 = vld [vmem:[%s5172_s14 + $0x2] ss:$0 sm:$0xff] }
0x15f1   :  { %4223 = vmatprep.subr.mxu0 %v4397_v44 }
0x15f3   :  { %v2235_v42 = vpop.permute.xlu0 %2234 }
0x15f4   :  { %2237 = vst.msk [vmem:[#allocation2] sm:$0xff] %vm534_vm7, %v2235_v42 }
0x15f7   :  { %v3038_v36 = vpop.permute.xlu0 %3037 }
0x15f8   :  { %3040 = vst.msk [vmem:[#allocation2 + $0x8] sm:$0xff] %vm534_vm7, %v3038_v36 }
0x15fb   :  { %v3218_v58 = vpop.permute.xlu0 %3217 }
0x15fc   :  { %3220 = vst.msk [vmem:[#allocation2 + $0x8] sm:$0xff] %vm707_vm8, %v3218_v58 }
0x15fd   :  { %v4364_v56 = vpop.eup %4363 }
0x15fe   :  { %v3311_v57 = vsel %vm1964_vm14, %v4364_v56, 0.0 }
0x15ff   :  { %3312 = vadd.xlane.f32.xlu1 %v3311_v57 }
0x1610   :  { %3316 = vrot.lane.b32.xlu1 %v4958_v37, %s4405_s22 }
0x1614   :  { %2414 = vrot.lane.b32.xlu1 %v4919_v19, %s4411_s30  ;;  %v3406_v19 = vld [vmem:[%s5166_s8 + $0x18] sm:$0xff] }
0x1618   :  { %2594 = vrot.lane.b32.xlu1 %v4950_v33, %s4412_s16  ;;  %v3405_v33 = vld [vmem:[%s5166_s8 + $0x10] sm:$0xff] }
0x1688   :  { %v3313_v44 = vpop.xlane.xlu1 %3312 }
0x1689   :  { %4365 = vrcp.f32 %v3313_v44 }
0x168c   :  { %v3317_v59 = vpop.permute.xlu1 %3316 }
0x168d   :  { %4224 = vmatpush3.msra.mxu0 %v3317_v59  ;;  %v3641_v59 = vld [vmem:[%s5169_s11 + $0x18] sm:$0xff] }
0x168e   :  { %4228 = vmatprep.subr.mxu0 %v3406_v19 }
0x1690   :  { %v2415_v60 = vpop.permute.xlu1 %2414 }
0x1691   :  { %2417 = vst.msk [vmem:[#allocation2] sm:$0xff] %vm707_vm8, %v2415_v60  ;;  %v3640_v60 = vld [vmem:[%s5169_s11 + $0x10] sm:$0xff] }
0x1694   :  { %v2595_v61 = vpop.permute.xlu1 %2594 }
0x1695   :  { %2597 = vst.msk [vmem:[#allocation2] sm:$0xff] %vm880_vm9, %v2595_v61  ;;  %v3639_v61 = vld [vmem:[%s5169_s11 + $0x8] sm:$0xff] }
0x1696   :  { %v4366_v62 = vpop.eup %4365 }
0x1697   :  { %v3315_v63 = vmul.f32 %v4366_v62, %v4364_v56  ;;  %v3638_v62 = vld [vmem:[%s5169_s11] sm:$0xff]  ;;  %s4413_s11 = smov [#allocation3]  }
0x1698   :  { %s3746_s25 = sshll.u32 %s4413_s11, 4  ;;  %s3747_s25 = int_to_ptr.vmem [resolvable:$true] %s3746_s25 }
0x1699   :  { %4226 = vmatmul.mubr.msk.f32.vlgmr.msra.gmra.mxu0 %vm1964_vm14, %v3315_v63  ;;  %v3843_v63 = vld [vmem:[%s5168_s10] ss:$0 sm:$0xff]  ;;  %s4375_s10 = scalar_lea.vmem %s3747_s25, 256  ;;  %p4380_p1 = scmp.lt.s32.totalorder %s3747_s25, %s3747_s25 }
0x169a   :  { %4229 = vmatpush3.msra.mxu0 %v3406_v19  ;;  %p4376_p0 = scmp.ne.s32.totalorder %s3747_s25, %s4375_s10  ;;  %p4381_p2 = scmp.lt.s32.totalorder %s4375_s10, %s4375_s10 }
0x169b   :  { %4230 = vmatprep.subr.mxu0 %v3405_v33 }
0x169c   :  { %v3401_v37 = vld [vmem:[#allocation2] sm:$0xff]  ;;  %4231 = vmatpush3.msra.mxu0 %v3405_v33  ;;  %p4382_p3 = por %p4381_p2, %p4380_p1 }
0x169d   :  { %4236 = vmatprep.mubr.msk.f32.mxu0 %vm55_vm0, %v3401_v37  ;;  %4232 = vmatprep.subr.mxu0 %v3404_v2 }
0x169e   :  { %4233 = vmatpush3.msra.mxu0 %v3404_v2  ;;  %p4383_p4 = pnand %p4382_p3, %p4376_p0 }
0x169f   :  { %4234 = vmatprep.subr.mxu0 %v3403_v3 }
0x16a0   :  { %4235 = vmatpush3.msra.mxu0 %v3403_v3 }
0x16a1   :  { %4250 = vmatprep.subr.mxu0 %v3645_v0 }
0x1759   :  { %v3392_v4 = vpop.f32.mrf.mxu0 }
0x175a   :  { %3397 = vrot.lane.b32.xlu1 %v3392_v4, %s4412_s16 }
0x175b   :  { %v4227_v5 = vpop.f32.mrf.mxu0 }
0x17cc   :  { %v3398_v6 = vpop.permute.xlu1 %3397 }
0x17cd   :  { %3400 = vst.msk [vmem:[#allocation2 + $0x8] sm:$0xff] %vm880_vm9, %v3398_v6  ;;  %v3848_v6 = vld [vmem:[%s5170_s12] ss:$0 sm:$0xff] }
0x17d4   :  { %v3402_v7 = vld [vmem:[#allocation2 + $0x8] sm:$0xff] }
0x17d5   :  { %4237 = vmatmul.mubr.msk.f32.vlgmr.msra.gmra.mxu0 %vm55_vm0, %v3402_v7 }
0x17d6   :  { %4251 = vmatpush3.msra.mxu0 %v3645_v0 }
0x17d7   :  { %4252 = vmatprep.subr.mxu0 %v3644_v45 }
0x17d8   :  { %4253 = vmatpush3.msra.mxu0 %v3644_v45 }
0x17d9   :  { %4254 = vmatprep.subr.mxu0 %v3643_v17 }
0x17da   :  { %4255 = vmatpush3.msra.mxu0 %v3643_v17 }
0x17db   :  { %4256 = vmatprep.subr.mxu0 %v3642_v31 }
0x17dc   :  { %4257 = vmatpush3.msra.mxu0 %v3642_v31 }
0x17dd   :  { %4258 = vmatprep.subr.mxu0 %v3641_v59 }
0x17de   :  { %4259 = vmatpush3.msra.mxu0 %v3641_v59 }
0x17df   :  { %4260 = vmatprep.subr.mxu0 %v3640_v60 }
0x17e0   :  { %4261 = vmatpush3.msra.mxu0 %v3640_v60 }
0x17e1   :  { %4262 = vmatprep.subr.mxu0 %v3639_v61 }
0x17e2   :  { %4263 = vmatpush3.msra.mxu0 %v3639_v61 }
0x17e3   :  { %4264 = vmatprep.subr.mxu0 %v3638_v62 }
0x17e4   :  { %4265 = vmatpush3.msra.mxu0 %v3638_v62 }
0x1895   :  { %v4238_v8 = vpop.f32.mrf.mxu0 }
0x1896   :  { %v5087_v9 = vadd.f32 %v4238_v8, %v4730_v21 }
0x1897   :  { %v3479_v12 = vpop.f32.mrf.mxu0 }
0x1898   :  { %v5090_v13 = vadd.f32 %v3479_v12, %v4733_v23  ;;  %v3495_v14 = vsel %vm55_vm0, %v5087_v9, 0.0 }
0x1899   :  { %3496 = vadd.xlane.f32.xlu1 %v3495_v14 }
0x189a   :  { %v3492_v15 = vsel %vm55_vm0, %v5090_v13, 0.0 }
0x189b   :  { %3493 = vadd.xlane.f32.xlu0 %v3492_v15 }
0x1922   :  { %v3497_v16 = vpop.xlane.xlu1 %3496 }
0x1923   :  { %v3499_v18 = vmul.f32 0.03125, %v3497_v16 }
0x1924   :  { %v3494_v20 = vpop.xlane.xlu0 %3493 }
0x1925   :  { %v3498_v22 = vmul.f32 0.03125, %v3494_v20  ;;  %v3501_v24 = vsub.f32 %v5087_v9, %v3499_v18 }
0x1927   :  { %v3500_v21 = vsub.f32 %v5090_v13, %v3498_v22  ;;  %v3503_v26 = vmul.f32 %v3501_v24, %v3501_v24  ;;  %v3535_v36 = vmul.f32 %v3841_v52, %v3501_v24 }
0x1929   :  { %v3502_v25 = vmul.f32 %v3500_v21, %v3500_v21  ;;  %v3507_v27 = vsel %vm55_vm0, %v3503_v26, 0.0  ;;  %v3534_v53 = vmul.f32 %v3841_v52, %v3500_v21 }
0x192b   :  { %v3504_v23 = vsel %vm55_vm0, %v3502_v25, 0.0 }
0x192c   :  { %3505 = vadd.xlane.f32.xlu0 %v3504_v23 }
0x1930   :  { %3508 = vadd.xlane.f32.xlu0 %v3507_v27 }
0x19b5   :  { %v3506_v46 = vpop.xlane.xlu0 %3505 }
0x19b6   :  { %v3510_v32 = vmul.f32 0.032258064, %v3506_v46 }
0x19b8   :  { %4367 = vrsqrt.f32 %v3510_v32  ;;  %vm3514_vm1 = vcmp.eq.f32.partialorder %v3510_v32, inf  ;;  %v3517_v39 = vand.u32 2147483648, %v3510_v32  ;;  %vm3516_vm2 = vcmp.eq.f32.partialorder %v3510_v32, 0.0 }
0x19b9   :  { %v3509_v35 = vpop.xlane.xlu0 %3508 }
0x19ba   :  { %v3511_v11 = vmul.f32 0.032258064, %v3509_v35 }
0x19bc   :  { %4369 = vrsqrt.f32 %v3511_v11  ;;  %vm3521_vm3 = vcmp.eq.f32.partialorder %v3511_v11, inf  ;;  %v3524_v48 = vand.u32 2147483648, %v3511_v11  ;;  %vm3523_vm4 = vcmp.eq.f32.partialorder %v3511_v11, 0.0 }
0x19c5   :  { %v4368_v10 = vpop.eup %4367 }
0x19c6   :  { %v3513_v34 = vmul.f32 %v4368_v10, %v3510_v32 }
0x19c8   :  { %v3515_v38 = vsel %vm3514_vm1, %v3510_v32, %v3513_v34 }
0x19c9   :  { %v4370_v40 = vpop.eup %4369  ;;  %v3518_v41 = vsel %vm3516_vm2, %v3517_v39, %v3515_v38 }
0x19ca   :  { %v3526_v43 = vadd.f32 1e-06, %v3518_v41  ;;  %v3520_v47 = vmul.f32 %v4370_v40, %v3511_v11 }
0x19cc   :  { %4371 = vrcp.f32 %v3526_v43  ;;  %v3522_v49 = vsel %vm3521_vm3, %v3511_v11, %v3520_v47 }
0x19cd   :  { %v3525_v50 = vsel %vm3523_vm4, %v3524_v48, %v3522_v49 }
0x19ce   :  { %v3527_v51 = vadd.f32 1e-06, %v3525_v50 }
0x19d0   :  { %4373 = vrcp.f32 %v3527_v51 }
0x19d9   :  { %v4372_v54 = vpop.eup %4371 }
0x19da   :  { %v3536_v42 = vmul.f32 %v4372_v54, %v3534_v53 }
0x19dc   :  { %v3542_v58 = vadd.f32 %v3842_v55, %v3536_v42 }
0x19dd   :  { %v4374_v56 = vpop.eup %4373 }
0x19de   :  { %v3537_v57 = vmul.f32 %v4374_v56, %v3535_v36  ;;  %4247 = vmatprep.mubr.msk.f32.mxu1 %vm55_vm0, %v3542_v58 }
0x19e0   :  { %v3543_v44 = vadd.f32 %v3842_v55, %v3537_v57 }
0x19e2   :  { %4248 = vmatmul.mubr.msk.f32.vlgmr.msra.gmra.mxu1 %vm55_vm0, %v3543_v44 }
0x1aa2   :  { %v4249_v37 = vpop.f32.mrf.mxu1 }
0x1aa3   :  { %v3633_v19 = vadd.f32 %v4249_v37, %v3843_v63 }
0x1aa4   :  { %v3627_v33 = vpop.f32.mrf.mxu1 }
0x1aa5   :  { %v3628_v2 = vadd.f32 %v3843_v63, %v3627_v33  ;;  %v3637_v4 = vmax.f32 %v3633_v19, 0.0 }
0x1aa7   :  { %v3636_v3 = vmax.f32 %v3628_v2, 0.0 }
0x1aa9   :  { %4266 = vmatprep.mubr.msk.f32.mxu0 %vm3646_vm5, %v3636_v3 }
0x1aaa   :  { %4267 = vmatmul.mubr.msk.f32.vlgmr.msra.gmra.mxu0 %vm3646_vm5, %v3637_v4 }
0x1b6a   :  { %v4268_v5 = vpop.f32.mrf.mxu0 }
0x1b6b   :  { %v3729_v7 = vadd.f32 %v4268_v5, %v5087_v9 }
0x1b6c   :  { %v3719_v8 = vpop.f32.mrf.mxu0 }
0x1b6d   :  { %v3738_v12 = vadd.f32 %v3848_v6, %v3729_v7  ;;  %v3728_v14 = vadd.f32 %v3719_v8, %v5090_v13 }
0x1b6f   :  { %3740 = vst.msk [vmem:[#allocation3 + $0x8] sm:$0xff] %vm55_vm0, %v3738_v12  ;;  %v3737_v15 = vadd.f32 %v3848_v6, %v3728_v14 }
0x1b71   :  { %3739 = vst.msk [vmem:[#allocation3] sm:$0xff] %vm55_vm0, %v3737_v15 }
0x1b72   :  { %4386 = shalt.err (!%p4383_p4)
}
0x1b73   :  { %s4414_s12 = smov 128  }
0x1b74   :  { %3752 = dma.vmem_to_hbm [thread:$0]  %s3747_s25, 256, %s5173_s15, [#allocation4], %s4414_s12, %s4414_s12, %s4410_s29  }
0x1b75   :  { %4395 = dma.done.wait [#allocation4], 256  }
0x1b76   :  { %4396 = vsyncadd [#allocation4], 4294967040 }
0x1b77   :  { %3756 = vsyncpa [#allocation4], 1 }

</bundles_post_ra>
